<compile_context>
chip_gen: v5e
topology: v5e:2x2
jax: 0.10.0
libtpu: 0.0.40
codegen_flags: <defaults>
</compile_context>

<pallas_src>
import functools

import jax
import jax.numpy as jnp
from jax import lax
from jax.experimental import pallas as pl
from jax.experimental.pallas import tpu as pltpu


def _resnet_conv_kernel(x_ref, w_ref, b_ref, out_ref, xpad_ref, *, TH, H, W, C):
    """One grid step = one (TH, W) output row-tile of one image.

    x_ref:    (H, W, C)       whole unpadded image; resident, re-fetched only when n changes
    w_ref:    (9, Cin, Cout)  all 9 tap weights, resident (constant index_map)
    b_ref:    (1, Cout)       bias, resident
    out_ref:  (TH, W, Cout)   output row-tile (conv + bias + residual)
    xpad_ref: (H+2, W+2, C)   VMEM scratch holding the zero-padded image
    """
    # Build the zero-padded image in VMEM once per image (first row-tile step).
    # h axis is "arbitrary" so this step is guaranteed to run before h > 0 steps.
    @pl.when(pl.program_id(1) == 0)
    def _():
        xpad_ref[...] = jnp.zeros_like(xpad_ref)
        xpad_ref[pl.ds(1, H), pl.ds(1, W), :] = x_ref[...]

    h0 = pl.program_id(1) * TH
    rows = TH * W

    # Center tap (dy=1, dx=1) == the unshifted input rows: aligned load straight
    # from the input block; it also serves as the residual term.
    center = x_ref[pl.ds(h0, TH), :, :]                               # (TH, W, C)

    acc = None
    # All 9 taps in a single grid step (fully unrolled), accumulated in registers;
    # the first tap writes `acc = dot(...)` directly (no zero-init).
    for dy in range(3):
        for dx in range(3):
            if dy == 1 and dx == 1:
                tap = center
            else:
                tap = xpad_ref[pl.ds(h0 + dy, TH), pl.ds(dx, W), :]   # (TH, W, C)
            contrib = jnp.dot(tap.reshape(rows, C), w_ref[dy * 3 + dx],
                              preferred_element_type=jnp.float32)     # (rows, Cout) f32
            acc = contrib if acc is None else acc + contrib

    res = acc + b_ref[...] + center.reshape(rows, C).astype(jnp.float32)
    out_ref[...] = res.reshape(TH, W, C).astype(out_ref.dtype)


def _pick_tile_rows(H, W, C, itemsize, target_rows=512, vmem_budget_bytes=2 << 20):
    """Largest divisor TH of H whose (TH, W, C) tile fits the budget; prefer TH*W >= target."""
    best = 1
    for th in range(1, H + 1):
        if H % th != 0:
            continue
        if th * W * C * itemsize > vmem_budget_bytes:
            break
        best = th
        if th * W >= target_rows:
            break
    return best


@jax.jit
def resnet_forward(x_nchw, w_hwio, bias):
    """out = Conv2d_3x3_same(x) + x, matching the PyTorch ResNet.forward."""
    N, C, H, W = x_nchw.shape
    KH, KW, Cin, Cout = w_hwio.shape
    assert (KH, KW) == (3, 3) and Cin == C and Cout == C

    # ---- glue: layout only (NCHW -> NHWC); padding is done inside the kernel ----
    x_nhwc = jnp.transpose(x_nchw, (0, 2, 3, 1))                  # (N,H,W,C)
    w_taps = w_hwio.reshape(9, Cin, Cout)                         # (9,Cin,Cout)
    bias2d = bias.reshape(1, Cout)                                # (1,Cout)

    TH = _pick_tile_rows(H, W, C, jnp.dtype(x_nchw.dtype).itemsize)
    grid = (N, H // TH)

    kernel = functools.partial(_resnet_conv_kernel, TH=TH, H=H, W=W, C=C)

    out_nhwc = pl.pallas_call(
        kernel,
        out_shape=jax.ShapeDtypeStruct((N, H, W, Cout), x_nchw.dtype),
        grid_spec=pltpu.PrefetchScalarGridSpec(
            num_scalar_prefetch=0,
            grid=grid,
            in_specs=[
                # whole unpadded image per n; index constant in h -> fetched once per image
                pl.BlockSpec((None, H, W, C), lambda n, h: (n, 0, 0, 0)),
                # all 9 tap weights resident for the whole kernel
                pl.BlockSpec((9, Cin, Cout), lambda n, h: (0, 0, 0)),
                pl.BlockSpec((1, Cout), lambda n, h: (0, 0)),
            ],
            out_specs=pl.BlockSpec((None, TH, W, Cout), lambda n, h: (n, h, 0, 0)),
            scratch_shapes=[pltpu.VMEM((H + 2, W + 2, C), x_nchw.dtype)],
        ),
        compiler_params=pltpu.CompilerParams(
            # h axis is a carried dependence (pad scratch built at h == 0) -> arbitrary
            dimension_semantics=("parallel", "arbitrary"),
        ),
    )(x_nhwc, w_taps, bias2d)

    # back to NCHW
    return jnp.transpose(out_nhwc, (0, 3, 1, 2))


def _reference(x_nchw, w_hwio, bias):
    x_nhwc = jnp.transpose(x_nchw, (0, 2, 3, 1))
    conv = lax.conv_general_dilated(
        x_nhwc,
        w_hwio,
        window_strides=(1, 1),
        padding="SAME",
        dimension_numbers=("NHWC", "HWIO", "NHWC"),
    )
    out = conv + bias.reshape(1, 1, 1, -1) + x_nhwc
    return jnp.transpose(out, (0, 3, 1, 2))


if __name__ == "__main__":
    N, C, H, W = 2, 4, 16, 16

    key = jax.random.PRNGKey(0)
    kx, kw, kb = jax.random.split(key, 3)

    x = jax.random.normal(kx, (N, C, H, W), dtype=jnp.float32)
    # deterministic synthetic conv params (HWIO layout)
    w = jax.random.normal(kw, (3, 3, C, C), dtype=jnp.float32) * 0.1
    b = jax.random.normal(kb, (C,), dtype=jnp.float32) * 0.1

    out = resnet_forward(x, w, b)
    out = jax.block_until_ready(out)

    ref = jax.block_until_ready(_reference(x, w, b))
    assert out.shape == (N, C, H, W)
    assert jnp.allclose(out, ref, atol=1e-3, rtol=1e-3)

    print("KERNEL_OK")
</pallas_src>

<mosaic_0001>
module attributes {stable_mosaic.version = 11 : i64} {
  func.func @_resnet_conv_kernel(%arg0: i32, %arg1: i32, %arg2: memref<1x16x16x4xf32, #tpu.memory_space<vmem>>, %arg3: memref<9x4x4xf32, #tpu.memory_space<vmem>>, %arg4: memref<1x4xf32, #tpu.memory_space<vmem>>, %arg5: memref<1x16x16x4xf32, #tpu.memory_space<vmem>>, %arg6: memref<18x18x4xf32, #tpu.memory_space<vmem>>) attributes {dimension_semantics = [#tpu.dimension_semantics<parallel>, #tpu.dimension_semantics<arbitrary>], iteration_bounds = array<i64: 2, 1>, scalar_prefetch = 0 : i64, scratch_operands = 1 : i64, tpu.core_type = #tpu.core_type<tc>, window_params = [{transform_indices = @transform_0, window_bounds = array<i64: 1, 16, 16, 4>}, {pipeline_mode = #tpu.pipeline_mode<synchronous>, transform_indices = @transform_1, window_bounds = array<i64: 9, 4, 4>}, {pipeline_mode = #tpu.pipeline_mode<synchronous>, transform_indices = @transform_2, window_bounds = array<i64: 1, 4>}, {transform_indices = @transform_3, window_bounds = array<i64: 1, 16, 16, 4>}]} {
    %c0_i32 = arith.constant 0 : i32
    %0 = arith.cmpi eq, %arg1, %c0_i32 : i32
    %1 = arith.extui %0 : i1 to i32
    %c0_i32_0 = arith.constant 0 : i32
    %2 = arith.cmpi ne, %1, %c0_i32_0 : i32
    scf.if %2 {
      %cst_58 = arith.constant 0.000000e+00 : f32
      %84 = vector.broadcast %cst_58 : f32 to vector<18x18x4xf32>
      %c0_59 = arith.constant 0 : index
      %c0_60 = arith.constant 0 : index
      %c0_61 = arith.constant 0 : index
      %85 = vector.load %arg6[%c0_59, %c0_60, %c0_61] : memref<18x18x4xf32, #tpu.memory_space<vmem>>, vector<18x18x4xf32>
      tpu.vector_store %arg6[%c0_59, %c0_60, %c0_61], %84 {strides = array<i32>} : memref<18x18x4xf32, #tpu.memory_space<vmem>>, vector<18x18x4xf32>,
      %c0_62 = arith.constant 0 : index
      %c0_63 = arith.constant 0 : index
      %c0_64 = arith.constant 0 : index
      %c0_65 = arith.constant 0 : index
      %86 = vector.load %arg2[%c0_62, %c0_63, %c0_64, %c0_65] : memref<1x16x16x4xf32, #tpu.memory_space<vmem>>, vector<1x16x16x4xf32>
      %87 = vector.shape_cast %86 : vector<1x16x16x4xf32> to vector<16x16x4xf32>
      %c1_66 = arith.constant 1 : index
      %c1_67 = arith.constant 1 : index
      %c0_68 = arith.constant 0 : index
      %88 = vector.load %arg6[%c1_66, %c1_67, %c0_68] : memref<18x18x4xf32, #tpu.memory_space<vmem>>, vector<16x16x4xf32>
      tpu.vector_store %arg6[%c1_66, %c1_67, %c0_68], %87 {strides = array<i32>} : memref<18x18x4xf32, #tpu.memory_space<vmem>>, vector<16x16x4xf32>,
    } else {
    }
    %c16_i32 = arith.constant 16 : i32
    %3 = arith.muli %arg1, %c16_i32 : i32
    %c0 = arith.constant 0 : index
    %4 = arith.index_cast %3 : i32 to index
    %c0_1 = arith.constant 0 : index
    %c0_2 = arith.constant 0 : index
    %5 = vector.load %arg2[%c0, %4, %c0_1, %c0_2] : memref<1x16x16x4xf32, #tpu.memory_space<vmem>>, vector<1x16x16x4xf32>
    %6 = vector.shape_cast %5 : vector<1x16x16x4xf32> to vector<16x16x4xf32>
    %c0_i32_3 = arith.constant 0 : i32
    %7 = arith.addi %3, %c0_i32_3 : i32
    %8 = arith.index_cast %7 : i32 to index
    %c0_4 = arith.constant 0 : index
    %c0_5 = arith.constant 0 : index
    %9 = vector.load %arg6[%8, %c0_4, %c0_5] : memref<18x18x4xf32, #tpu.memory_space<vmem>>, vector<16x16x4xf32>
    %10 = vector.shape_cast %9 : vector<16x16x4xf32> to vector<256x4xf32>
    %c0_6 = arith.constant 0 : index
    %c0_7 = arith.constant 0 : index
    %c0_8 = arith.constant 0 : index
    %11 = vector.load %arg3[%c0_6, %c0_7, %c0_8] : memref<9x4x4xf32, #tpu.memory_space<vmem>>, vector<1x4x4xf32>
    %12 = vector.shape_cast %11 : vector<1x4x4xf32> to vector<4x4xf32>
    %cst = arith.constant dense<0.000000e+00> : vector<256x4xf32>
    %13 = tpu.matmul %10, %12, %cst {dimension_numbers = #tpu.dot_dimension_numbers<[1], [0], [0], [1], [0, 0, 1, 1], [], []>} : vector<256x4xf32>, vector<4x4xf32>, vector<256x4xf32> -> vector<256x4xf32>
    %c0_i32_9 = arith.constant 0 : i32
    %14 = arith.addi %3, %c0_i32_9 : i32
    %15 = arith.index_cast %14 : i32 to index
    %c1 = arith.constant 1 : index
    %c0_10 = arith.constant 0 : index
    %16 = vector.load %arg6[%15, %c1, %c0_10] : memref<18x18x4xf32, #tpu.memory_space<vmem>>, vector<16x16x4xf32>
    %17 = vector.shape_cast %16 : vector<16x16x4xf32> to vector<256x4xf32>
    %c1_11 = arith.constant 1 : index
    %c0_12 = arith.constant 0 : index
    %c0_13 = arith.constant 0 : index
    %18 = vector.load %arg3[%c1_11, %c0_12, %c0_13] : memref<9x4x4xf32, #tpu.memory_space<vmem>>, vector<1x4x4xf32>
    %19 = vector.shape_cast %18 : vector<1x4x4xf32> to vector<4x4xf32>
    %cst_14 = arith.constant dense<0.000000e+00> : vector<256x4xf32>
    %20 = tpu.matmul %17, %19, %cst_14 {dimension_numbers = #tpu.dot_dimension_numbers<[1], [0], [0], [1], [0, 0, 1, 1], [], []>} : vector<256x4xf32>, vector<4x4xf32>, vector<256x4xf32> -> vector<256x4xf32>
    %21 = arith.addf %13, %20 : vector<256x4xf32>
    %c0_i32_15 = arith.constant 0 : i32
    %22 = arith.addi %3, %c0_i32_15 : i32
    %23 = arith.index_cast %22 : i32 to index
    %c2 = arith.constant 2 : index
    %c0_16 = arith.constant 0 : index
    %24 = vector.load %arg6[%23, %c2, %c0_16] : memref<18x18x4xf32, #tpu.memory_space<vmem>>, vector<16x16x4xf32>
    %25 = vector.shape_cast %24 : vector<16x16x4xf32> to vector<256x4xf32>
    %c2_17 = arith.constant 2 : index
    %c0_18 = arith.constant 0 : index
    %c0_19 = arith.constant 0 : index
    %26 = vector.load %arg3[%c2_17, %c0_18, %c0_19] : memref<9x4x4xf32, #tpu.memory_space<vmem>>, vector<1x4x4xf32>
    %27 = vector.shape_cast %26 : vector<1x4x4xf32> to vector<4x4xf32>
    %cst_20 = arith.constant dense<0.000000e+00> : vector<256x4xf32>
    %28 = tpu.matmul %25, %27, %cst_20 {dimension_numbers = #tpu.dot_dimension_numbers<[1], [0], [0], [1], [0, 0, 1, 1], [], []>} : vector<256x4xf32>, vector<4x4xf32>, vector<256x4xf32> -> vector<256x4xf32>
    %29 = arith.addf %21, %28 : vector<256x4xf32>
    %c1_i32 = arith.constant 1 : i32
    %30 = arith.addi %3, %c1_i32 : i32
    %31 = arith.index_cast %30 : i32 to index
    %c0_21 = arith.constant 0 : index
    %c0_22 = arith.constant 0 : index
    %32 = vector.load %arg6[%31, %c0_21, %c0_22] : memref<18x18x4xf32, #tpu.memory_space<vmem>>, vector<16x16x4xf32>
    %33 = vector.shape_cast %32 : vector<16x16x4xf32> to vector<256x4xf32>
    %c3 = arith.constant 3 : index
    %c0_23 = arith.constant 0 : index
    %c0_24 = arith.constant 0 : index
    %34 = vector.load %arg3[%c3, %c0_23, %c0_24] : memref<9x4x4xf32, #tpu.memory_space<vmem>>, vector<1x4x4xf32>
    %35 = vector.shape_cast %34 : vector<1x4x4xf32> to vector<4x4xf32>
    %cst_25 = arith.constant dense<0.000000e+00> : vector<256x4xf32>
    %36 = tpu.matmul %33, %35, %cst_25 {dimension_numbers = #tpu.dot_dimension_numbers<[1], [0], [0], [1], [0, 0, 1, 1], [], []>} : vector<256x4xf32>, vector<4x4xf32>, vector<256x4xf32> -> vector<256x4xf32>
    %37 = arith.addf %29, %36 : vector<256x4xf32>
    %38 = vector.shape_cast %6 : vector<16x16x4xf32> to vector<256x4xf32>
    %c4 = arith.constant 4 : index
    %c0_26 = arith.constant 0 : index
    %c0_27 = arith.constant 0 : index
    %39 = vector.load %arg3[%c4, %c0_26, %c0_27] : memref<9x4x4xf32, #tpu.memory_space<vmem>>, vector<1x4x4xf32>
    %40 = vector.shape_cast %39 : vector<1x4x4xf32> to vector<4x4xf32>
    %cst_28 = arith.constant dense<0.000000e+00> : vector<256x4xf32>
    %41 = tpu.matmul %38, %40, %cst_28 {dimension_numbers = #tpu.dot_dimension_numbers<[1], [0], [0], [1], [0, 0, 1, 1], [], []>} : vector<256x4xf32>, vector<4x4xf32>, vector<256x4xf32> -> vector<256x4xf32>
    %42 = arith.addf %37, %41 : vector<256x4xf32>
    %c1_i32_29 = arith.constant 1 : i32
    %43 = arith.addi %3, %c1_i32_29 : i32
    %44 = arith.index_cast %43 : i32 to index
    %c2_30 = arith.constant 2 : index
    %c0_31 = arith.constant 0 : index
    %45 = vector.load %arg6[%44, %c2_30, %c0_31] : memref<18x18x4xf32, #tpu.memory_space<vmem>>, vector<16x16x4xf32>
    %46 = vector.shape_cast %45 : vector<16x16x4xf32> to vector<256x4xf32>
    %c5 = arith.constant 5 : index
    %c0_32 = arith.constant 0 : index
    %c0_33 = arith.constant 0 : index
    %47 = vector.load %arg3[%c5, %c0_32, %c0_33] : memref<9x4x4xf32, #tpu.memory_space<vmem>>, vector<1x4x4xf32>
    %48 = vector.shape_cast %47 : vector<1x4x4xf32> to vector<4x4xf32>
    %cst_34 = arith.constant dense<0.000000e+00> : vector<256x4xf32>
    %49 = tpu.matmul %46, %48, %cst_34 {dimension_numbers = #tpu.dot_dimension_numbers<[1], [0], [0], [1], [0, 0, 1, 1], [], []>} : vector<256x4xf32>, vector<4x4xf32>, vector<256x4xf32> -> vector<256x4xf32>
    %50 = arith.addf %42, %49 : vector<256x4xf32>
    %c2_i32 = arith.constant 2 : i32
    %51 = arith.addi %3, %c2_i32 : i32
    %52 = arith.index_cast %51 : i32 to index
    %c0_35 = arith.constant 0 : index
    %c0_36 = arith.constant 0 : index
    %53 = vector.load %arg6[%52, %c0_35, %c0_36] : memref<18x18x4xf32, #tpu.memory_space<vmem>>, vector<16x16x4xf32>
    %54 = vector.shape_cast %53 : vector<16x16x4xf32> to vector<256x4xf32>
    %c6 = arith.constant 6 : index
    %c0_37 = arith.constant 0 : index
    %c0_38 = arith.constant 0 : index
    %55 = vector.load %arg3[%c6, %c0_37, %c0_38] : memref<9x4x4xf32, #tpu.memory_space<vmem>>, vector<1x4x4xf32>
    %56 = vector.shape_cast %55 : vector<1x4x4xf32> to vector<4x4xf32>
    %cst_39 = arith.constant dense<0.000000e+00> : vector<256x4xf32>
    %57 = tpu.matmul %54, %56, %cst_39 {dimension_numbers = #tpu.dot_dimension_numbers<[1], [0], [0], [1], [0, 0, 1, 1], [], []>} : vector<256x4xf32>, vector<4x4xf32>, vector<256x4xf32> -> vector<256x4xf32>
    %58 = arith.addf %50, %57 : vector<256x4xf32>
    %c2_i32_40 = arith.constant 2 : i32
    %59 = arith.addi %3, %c2_i32_40 : i32
    %60 = arith.index_cast %59 : i32 to index
    %c1_41 = arith.constant 1 : index
    %c0_42 = arith.constant 0 : index
    %61 = vector.load %arg6[%60, %c1_41, %c0_42] : memref<18x18x4xf32, #tpu.memory_space<vmem>>, vector<16x16x4xf32>
    %62 = vector.shape_cast %61 : vector<16x16x4xf32> to vector<256x4xf32>
    %c7 = arith.constant 7 : index
    %c0_43 = arith.constant 0 : index
    %c0_44 = arith.constant 0 : index
    %63 = vector.load %arg3[%c7, %c0_43, %c0_44] : memref<9x4x4xf32, #tpu.memory_space<vmem>>, vector<1x4x4xf32>
    %64 = vector.shape_cast %63 : vector<1x4x4xf32> to vector<4x4xf32>
    %cst_45 = arith.constant dense<0.000000e+00> : vector<256x4xf32>
    %65 = tpu.matmul %62, %64, %cst_45 {dimension_numbers = #tpu.dot_dimension_numbers<[1], [0], [0], [1], [0, 0, 1, 1], [], []>} : vector<256x4xf32>, vector<4x4xf32>, vector<256x4xf32> -> vector<256x4xf32>
    %66 = arith.addf %58, %65 : vector<256x4xf32>
    %c2_i32_46 = arith.constant 2 : i32
    %67 = arith.addi %3, %c2_i32_46 : i32
    %68 = arith.index_cast %67 : i32 to index
    %c2_47 = arith.constant 2 : index
    %c0_48 = arith.constant 0 : index
    %69 = vector.load %arg6[%68, %c2_47, %c0_48] : memref<18x18x4xf32, #tpu.memory_space<vmem>>, vector<16x16x4xf32>
    %70 = vector.shape_cast %69 : vector<16x16x4xf32> to vector<256x4xf32>
    %c8 = arith.constant 8 : index
    %c0_49 = arith.constant 0 : index
    %c0_50 = arith.constant 0 : index
    %71 = vector.load %arg3[%c8, %c0_49, %c0_50] : memref<9x4x4xf32, #tpu.memory_space<vmem>>, vector<1x4x4xf32>
    %72 = vector.shape_cast %71 : vector<1x4x4xf32> to vector<4x4xf32>
    %cst_51 = arith.constant dense<0.000000e+00> : vector<256x4xf32>
    %73 = tpu.matmul %70, %72, %cst_51 {dimension_numbers = #tpu.dot_dimension_numbers<[1], [0], [0], [1], [0, 0, 1, 1], [], []>} : vector<256x4xf32>, vector<4x4xf32>, vector<256x4xf32> -> vector<256x4xf32>
    %74 = arith.addf %66, %73 : vector<256x4xf32>
    %c0_52 = arith.constant 0 : index
    %c0_53 = arith.constant 0 : index
    %75 = vector.load %arg4[%c0_52, %c0_53] : memref<1x4xf32, #tpu.memory_space<vmem>>, vector<1x4xf32>
    %76 = vector.broadcast %75 : vector<1x4xf32> to vector<256x4xf32>
    %77 = arith.addf %74, %76 : vector<256x4xf32>
    %78 = vector.shape_cast %6 : vector<16x16x4xf32> to vector<256x4xf32>
    %79 = arith.addf %77, %78 : vector<256x4xf32>
    %80 = vector.shape_cast %79 : vector<256x4xf32> to vector<16x16x4xf32>
    %c0_54 = arith.constant 0 : index
    %c0_55 = arith.constant 0 : index
    %c0_56 = arith.constant 0 : index
    %c0_57 = arith.constant 0 : index
    %81 = vector.load %arg5[%c0_54, %c0_55, %c0_56, %c0_57] : memref<1x16x16x4xf32, #tpu.memory_space<vmem>>, vector<1x16x16x4xf32>
    %82 = vector.shape_cast %81 : vector<1x16x16x4xf32> to vector<16x16x4xf32>
    %83 = vector.shape_cast %80 : vector<16x16x4xf32> to vector<1x16x16x4xf32>
    tpu.vector_store %arg5[%c0_54, %c0_55, %c0_56, %c0_57], %83 {strides = array<i32>} : memref<1x16x16x4xf32, #tpu.memory_space<vmem>>, vector<1x16x16x4xf32>,
    return
  }
  func.func @transform_0(%arg0: i32, %arg1: i32) -> (i32, i32, i32, i32) {
    %c0_i32 = arith.constant 0 : i32
    %c0_i32_0 = arith.constant 0 : i32
    %c0_i32_1 = arith.constant 0 : i32
    %c0_i32_2 = arith.constant 0 : i32
    return %arg0, %c0_i32, %c0_i32_0, %c0_i32_1 : i32, i32, i32, i32
  }
  func.func @transform_1(%arg0: i32, %arg1: i32) -> (i32, i32, i32) {
    %c0_i32 = arith.constant 0 : i32
    %c0_i32_0 = arith.constant 0 : i32
    %c0_i32_1 = arith.constant 0 : i32
    %c0_i32_2 = arith.constant 0 : i32
    return %c0_i32, %c0_i32_0, %c0_i32_1 : i32, i32, i32
  }
  func.func @transform_2(%arg0: i32, %arg1: i32) -> (i32, i32) {
    %c0_i32 = arith.constant 0 : i32
    %c0_i32_0 = arith.constant 0 : i32
    %c0_i32_1 = arith.constant 0 : i32
    return %c0_i32, %c0_i32_0 : i32, i32
  }
  func.func @transform_3(%arg0: i32, %arg1: i32) -> (i32, i32, i32, i32) {
    %c0_i32 = arith.constant 0 : i32
    %c0_i32_0 = arith.constant 0 : i32
    %c0_i32_1 = arith.constant 0 : i32
    return %arg0, %arg1, %c0_i32, %c0_i32_0 : i32, i32, i32, i32
  }
}

</mosaic_0001>

<bundles_post_ra>
// kernel: resnet_forward.1
= control target key start
LH: loop header
LB: loop body
LE: loop exit
PB: predicated region body
PF: predicated region fallthrough
CT: control target
= control target key end

     0   :  { %s3522_s12 = smov 0   ;;  %s3524_s13 = smov 0   ;;  %s4808_s0 = inlined_call_operand.vmem [shape: f32[2,16,16,4], index: 0, kind: input, shape index: {}]   ;;  %s4809_s1 = inlined_call_operand.vmem [shape: f32[9,4,4], index: 1, kind: input, shape index: {}]   ;;  %s4810_s2 = inlined_call_operand.vmem [shape: f32[1,4], index: 2, kind: input, shape index: {}]   ;;  %s4811_s3 = inlined_call_operand.vmem [shape: f32[2,16,16,4], index: 3, kind: output, shape index: {}]  }
   0x1   :  { %s3526_s14 = smov 0  }
   0x2 LB: > { %s25_s15 = sadd.s32 1, %s3495_s13  ;;  %p2974_p0 = scmp.ge.s32.totalorder %s3499_s14, 1  ;;  %s3499_s14 = sphi %s3526_s14, %s13_s14   ;;  %s3495_s13 = sphi %s3524_s13, %s5022_s13   ;;  %s3491_s12 = sphi %s3522_s12, %s5021_s12  }
   0x3   : > { %p27_p1 = scmp.ge.s32.totalorder %s25_s15, 2  ;;  %p151_p2 = scmp.lt.s32.totalorder %s3499_s14, 3 }
   0x5   : > { %s5024_s15 = smov (%p27_p1, %s25_s15), 0  ;;  %p152_p3 = pnand %p2974_p0, %p151_p2 }
   0x7   : > { %155 = sbr.rel (%p152_p3) target bundleno = 789 (0x315), region = 32 }
   0xc   : > { %v2979_v0 = vld [vmem:[%s4809_s1 + $0x4] sm:$0xf]  ;;  %vm522_vm0 = vcmask 1043456   ;;  %p180_p4 = scmp.lt.s32.totalorder %s3491_s12, 1  ;;  %vm200_vm1 = vcmask 31744   ;;  %v3501_v1 = vmov 0.0  }
   0xd   : > { %3448 = vmatpush.msk.msra.mxu1 %vm522_vm0, %v2979_v0  ;;  %3449 = vmatpush.msk.msra.mxu2 %vm522_vm0, %v2979_v0  ;;  %214 = vst.msk [vmem:[#allocation2 + $0x60] sm:$0xff] %vm200_vm1, %v3501_v1  ;;  %v3046_v4 = vld [vmem:[%s4809_s1 + $0x8] sm:$0xf]  ;;  %v3112_v5 = vld [vmem:[%s4809_s1 + $0xc] sm:$0xf]  ;;  %vm203_vm2 = vcmask 25600  }
   0xe   : > { %s5026_s12 = smov (!%p180_p4, %s3491_s12), 1  ;;  %215 = vst.msk [vmem:[#allocation2 + $0x68] sm:$0xff] %vm200_vm1, %v3501_v1  ;;  %3450 = vmatpush.msk.msra.mxu3 %vm522_vm0, %v2979_v0  ;;  %2980 = vmatpush.msk.msra.mxu0 %vm522_vm0, %v2979_v0  ;;  %v390_v6 = vld [vmem:[%s4809_s1] sm:$0xf]  ;;  %v3146_v10 = vld [vmem:[%s4809_s1 + $0x10] sm:$0xf] }
   0xf   : > { %201 = vst.msk [vmem:[#allocation2] sm:$0xff] %vm200_vm1, %v3501_v1  ;;  %s3446_s18 = sshll.u32 %s5026_s12, 8  ;;  %3047 = vmatpush.msk.msrb.mxu2 %vm522_vm0, %v3046_v4  ;;  %3013 = vmatpush.msk.msrb.mxu1 %vm522_vm0, %v390_v6  ;;  %v3278_v57 = vld [vmem:[%s4809_s1 + $0x18] sm:$0xf]  ;;  %v3344_v58 = vld [vmem:[%s4809_s1 + $0x1c] sm:$0xf] }
  0x10   : > { %202 = vst.msk [vmem:[#allocation2 + $0x8] sm:$0xff] %vm200_vm1, %v3501_v1  ;;  %s3563_s21 = scalar_lea.vmem %s4808_s0, %s3446_s18  ;;  %3113 = vmatpush.msk.msrb.mxu3 %vm522_vm0, %v3112_v5  ;;  %3147 = vmatpush.msk.msrb.mxu0 %vm522_vm0, %v3146_v10  ;;  %v3212_v59 = vld [vmem:[%s4809_s1 + $0x14] sm:$0xf]  ;;  %v3410_v0 = vld [vmem:[%s4809_s1 + $0x20] sm:$0xf]  ;;  %s4560_s20 = scalar_lea.vmem %s4811_s3, %s3446_s18 }
  0x11   : > { %205 = vst.msk [vmem:[#allocation2 + $0x18] sm:$0xff] %vm200_vm1, %v3501_v1  ;;  %v3568_v2 = vld [vmem:[%s3563_s21 + $0x30] sm:$0xff]  ;;  %v3661_v11 = vld [vmem:[%s3563_s21 + $0x38] sm:$0xff]  ;;  %v3714_v18 = vld [vmem:[%s3563_s21 + $0x40] sm:$0xff] }
  0x12   : > { %4871 = vst [vmem:[#allocation3_spill] sm:$0xff] %v3568_v2  ;;  %v3644_v7 = vld [vmem:[%s3563_s21 + $0x70] sm:$0xff]  ;;  %v3704_v16 = vld [vmem:[%s3563_s21 + $0x78] sm:$0xff]  ;;  %v3719_v19 = vld [vmem:[%s3563_s21 + $0x80] sm:$0xff] }
  0x13   : > { %206 = vst.msk [vmem:[#allocation2 + $0x20] sm:$0xff] %vm200_vm1, %v3501_v1  ;;  %v3649_v9 = vld [vmem:[%s3563_s21 + $0xb0] sm:$0xff]  ;;  %v3709_v17 = vld [vmem:[%s3563_s21 + $0xb8] sm:$0xff]  ;;  %v3724_v20 = vld [vmem:[%s3563_s21 + $0xc0] sm:$0xff] }
  0x14   : > { %295 = vst.msk [vmem:[#allocation2 + $0x61] sm:$0xff] %vm200_vm1, %v3568_v2  ;;  %v3729_v21 = vld [vmem:[%s3563_s21 + $0x48] sm:$0xff]  ;;  %v3739_v23 = vld [vmem:[%s3563_s21] sm:$0xff]  ;;  %v3749_v25 = vld [vmem:[%s3563_s21 + $0x50] sm:$0xff] }
  0x15   : > { %208 = vst.msk [vmem:[#allocation2 + $0x30] sm:$0xff] %vm200_vm1, %v3501_v1  ;;  %v3734_v22 = vld [vmem:[%s3563_s21 + $0x88] sm:$0xff]  ;;  %v3754_v27 = vld [vmem:[%s3563_s21 + $0x90] sm:$0xff]  ;;  %v3772_v32 = vld [vmem:[%s3563_s21 + $0x58] sm:$0xff] }
  0x16   : > { %209 = vst.msk [vmem:[#allocation2 + $0x38] sm:$0xff] %vm200_vm1, %v3501_v1  ;;  %v3744_v24 = vld [vmem:[%s3563_s21 + $0xc8] sm:$0xff]  ;;  %v3766_v31 = vld [vmem:[%s3563_s21 + $0xd0] sm:$0xff]  ;;  %v3777_v33 = vld [vmem:[%s3563_s21 + $0x98] sm:$0xff] }
  0x17   : > { %211 = vst.msk [vmem:[#allocation2 + $0x48] sm:$0xff] %vm200_vm1, %v3501_v1  ;;  %v391_v8 = vld [vmem:[#allocation2 + $0x1] sm:$0xff]  ;;  %v3782_v34 = vld [vmem:[%s3563_s21 + $0x10] sm:$0xff]  ;;  %v3787_v36 = vld [vmem:[%s3563_s21 + $0xd8] sm:$0xff] }
  0x18   : > { %212 = vst.msk [vmem:[#allocation2 + $0x50] sm:$0xff] %vm200_vm1, %v3501_v1  ;;  %2981 = vmatmul.msk.f32.vlgmr.msra.gmra.mxu0 %vm200_vm1, %v391_v8  ;;  %v3760_v29 = vld [vmem:[%s3563_s21 + $0x8] sm:$0xff]  ;;  %v3792_v39 = vld [vmem:[%s3563_s21 + $0x60] sm:$0xff]  ;;  %v3804_v42 = vld [vmem:[%s3563_s21 + $0x18] sm:$0xff] }
  0x19   : > { %217 = vst.msk [vmem:[#allocation2 + $0x78] sm:$0xff] %vm200_vm1, %v3501_v1  ;;  %v3798_v41 = vld [vmem:[%s3563_s21 + $0xa0] sm:$0xff]  ;;  %v3816_v44 = vld [vmem:[%s3563_s21 + $0x68] sm:$0xff]  ;;  %3411 = vmatpush.msk.msra.mxu0 %vm522_vm0, %v3410_v0 }
  0x1a   : > { %218 = vst.msk [vmem:[#allocation2 + $0x80] sm:$0xff] %vm200_vm1, %v3501_v1  ;;  %v3810_v43 = vld [vmem:[%s3563_s21 + $0xe0] sm:$0xff]  ;;  %v3821_v45 = vld [vmem:[%s3563_s21 + $0xa8] sm:$0xff] }
  0x1b   : > { %v399_v3 = vld [vmem:[#allocation2 + $0x61] sm:$0xff]  ;;  %220 = vst.msk [vmem:[#allocation2 + $0x90] sm:$0xff] %vm200_vm1, %v3501_v1 }
  0x1c   : > { %2989 = vmatmul.msk.f32.vlgmr.msra.gmra.mxu1 %vm200_vm1, %v399_v3  ;;  %221 = vst.msk [vmem:[#allocation2 + $0x98] sm:$0xff] %vm200_vm1, %v3501_v1  ;;  %v3826_v47 = vld [vmem:[%s3563_s21 + $0x20] sm:$0xff]  ;;  %v3831_v49 = vld [vmem:[%s3563_s21 + $0xe8] sm:$0xff] }
  0x1d   : > { %223 = vst.msk [vmem:[#allocation2 + $0xa8] sm:$0xff] %vm200_vm1, %v3501_v1  ;;  %v3843_v52 = vld [vmem:[%s3563_s21 + $0x28] sm:$0xff]  ;;  %3213 = vmatpush.msk.msra.mxu1 %vm522_vm0, %v3212_v59 }
  0x1e   : > { %224 = vst.msk [vmem:[#allocation2 + $0xb0] sm:$0xff] %vm200_vm1, %v3501_v1 }
  0x1f   : > { %226 = vst.msk [vmem:[#allocation2 + $0xc0] sm:$0xff] %vm200_vm1, %v3501_v1 }
  0x20   : > { %227 = vst.msk [vmem:[#allocation2 + $0xc8] sm:$0xff] %vm200_vm1, %v3501_v1 }
  0x21   : > { %229 = vst.msk [vmem:[#allocation2 + $0xd8] sm:$0xff] %vm200_vm1, %v3501_v1 }
  0x22   : > { %230 = vst.msk [vmem:[#allocation2 + $0xe0] sm:$0xff] %vm200_vm1, %v3501_v1 }
  0x23   : > { %232 = vst.msk [vmem:[#allocation2 + $0xf0] sm:$0xff] %vm200_vm1, %v3501_v1 }
  0x24   : > { %233 = vst.msk [vmem:[#allocation2 + $0xf8] sm:$0xff] %vm200_vm1, %v3501_v1 }
  0x25   : > { %235 = vst.msk [vmem:[#allocation2 + $0x108] sm:$0xff] %vm200_vm1, %v3501_v1 }
  0x26   : > { %236 = vst.msk [vmem:[#allocation2 + $0x110] sm:$0xff] %vm200_vm1, %v3501_v1 }
  0x27   : > { %238 = vst.msk [vmem:[#allocation2 + $0x120] sm:$0xff] %vm200_vm1, %v3501_v1 }
  0x28   : > { %239 = vst.msk [vmem:[#allocation2 + $0x128] sm:$0xff] %vm200_vm1, %v3501_v1 }
  0x29   : > { %241 = vst.msk [vmem:[#allocation2 + $0x138] sm:$0xff] %vm200_vm1, %v3501_v1 }
  0x2a   : > { %242 = vst.msk [vmem:[#allocation2 + $0x140] sm:$0xff] %vm200_vm1, %v3501_v1 }
  0x2b   : > { %244 = vst.msk [vmem:[#allocation2 + $0x150] sm:$0xff] %vm200_vm1, %v3501_v1 }
  0x2c   : > { %245 = vst.msk [vmem:[#allocation2 + $0x158] sm:$0xff] %vm200_vm1, %v3501_v1 }
  0x2d   : > { %247 = vst.msk [vmem:[#allocation2 + $0x168] sm:$0xff] %vm200_vm1, %v3501_v1 }
  0x2e   : > { %248 = vst.msk [vmem:[#allocation2 + $0x170] sm:$0xff] %vm200_vm1, %v3501_v1 }
  0x2f   : > { %250 = vst.msk [vmem:[#allocation2 + $0x180] sm:$0xff] %vm200_vm1, %v3501_v1 }
  0x30   : > { %251 = vst.msk [vmem:[#allocation2 + $0x188] sm:$0xff] %vm200_vm1, %v3501_v1 }
  0x31   : > { %4872 = vst [vmem:[#allocation4_spill] sm:$0xff] %v3644_v7 }
  0x32   : > { %253 = vst.msk [vmem:[#allocation2 + $0x198] sm:$0xff] %vm200_vm1, %v3501_v1 }
  0x33   : > { %4873 = vst [vmem:[#allocation5_spill] sm:$0xff] %v3649_v9 }
  0x34   : > { %254 = vst.msk [vmem:[#allocation2 + $0x1a0] sm:$0xff] %vm200_vm1, %v3501_v1 }
  0x35   : > { %303 = vst.msk [vmem:[#allocation2 + $0xc1] sm:$0xff] %vm200_vm1, %v3644_v7 }
  0x36   : > { %4874 = vst [vmem:[#allocation6_spill] sm:$0xff] %v3661_v11 }
  0x37   : > { %311 = vst.msk [vmem:[#allocation2 + $0x121] sm:$0xff] %vm200_vm1, %v3649_v9 }
  0x38   : > { %216 = vst.msk [vmem:[#allocation2 + $0x70] sm:$0x3] %vm203_vm2, %v3501_v1 }
  0x39   : > { %296 = vst.msk [vmem:[#allocation2 + $0x69] sm:$0xff] %vm200_vm1, %v3661_v11 }
  0x3a   : > { %204 = vst.msk [vmem:[#allocation2 + $0x10] sm:$0x3] %vm203_vm2, %v3501_v1 }
  0x3b   : > { %207 = vst.msk [vmem:[#allocation2 + $0x28] sm:$0x3] %vm203_vm2, %v3501_v1 }
  0x3c   : > { %210 = vst.msk [vmem:[#allocation2 + $0x40] sm:$0x3] %vm203_vm2, %v3501_v1  ;;  %v407_v12 = vld [vmem:[#allocation2 + $0xc1] sm:$0xff] }
  0x3d   : > { %213 = vst.msk [vmem:[#allocation2 + $0x58] sm:$0x3] %vm203_vm2, %v3501_v1  ;;  %2997 = vmatmul.msk.f32.vlgmr.msra.gmra.mxu2 %vm200_vm1, %v407_v12  ;;  %v358_v12 = vld [vmem:[#allocation2] sm:$0xff] }
  0x3e   : > { %v415_v13 = vld [vmem:[#allocation2 + $0x121] sm:$0xff]  ;;  %219 = vst.msk [vmem:[#allocation2 + $0x88] sm:$0x3] %vm203_vm2, %v3501_v1  ;;  %3279 = vmatpush.msk.msra.mxu2 %vm522_vm0, %v3278_v57 }
  0x3f   : > { %3005 = vmatmul.msk.f32.vlgmr.msra.gmra.mxu3 %vm200_vm1, %v415_v13  ;;  %222 = vst.msk [vmem:[#allocation2 + $0xa0] sm:$0x3] %vm203_vm2, %v3501_v1  ;;  %v851_v13 = vld [vmem:[#allocation2 + $0x2] sm:$0xff] }
  0x40   : > { %v400_v14 = vld [vmem:[#allocation2 + $0x69] sm:$0xff]  ;;  %225 = vst.msk [vmem:[#allocation2 + $0xb8] sm:$0x3] %vm203_vm2, %v3501_v1  ;;  %3345 = vmatpush.msk.msra.mxu3 %vm522_vm0, %v3344_v58 }
  0x41   : > { %2990 = vmatmul.msk.f32.gmra.mxu1 %vm200_vm1, %v400_v14  ;;  %228 = vst.msk [vmem:[#allocation2 + $0xd0] sm:$0x3] %vm203_vm2, %v3501_v1  ;;  %v392_v15 = vld [vmem:[#allocation2 + $0x9] sm:$0xff] }
  0x42   : > { %231 = vst.msk [vmem:[#allocation2 + $0xe8] sm:$0x3] %vm203_vm2, %v3501_v1  ;;  %2982 = vmatmul.msk.f32.gmra.mxu0 %vm200_vm1, %v392_v15  ;;  %v359_v15 = vld [vmem:[#allocation2 + $0x8] sm:$0xff] }
  0x43   : > { %234 = vst.msk [vmem:[#allocation2 + $0x100] sm:$0x3] %vm203_vm2, %v3501_v1  ;;  %v3965_v57 = vld [vmem:[#allocation2 + $0x68] sm:$0xff] }
  0x44   : > { %237 = vst.msk [vmem:[#allocation2 + $0x118] sm:$0x3] %vm203_vm2, %v3501_v1  ;;  %v3977_v59 = vld [vmem:[#allocation2 + $0x62] sm:$0xff] }
  0x45   : > { %240 = vst.msk [vmem:[#allocation2 + $0x130] sm:$0x3] %vm203_vm2, %v3501_v1 }
  0x46   : > { %243 = vst.msk [vmem:[#allocation2 + $0x148] sm:$0x3] %vm203_vm2, %v3501_v1 }
  0x47   : > { %246 = vst.msk [vmem:[#allocation2 + $0x160] sm:$0x3] %vm203_vm2, %v3501_v1 }
  0x48   : > { %249 = vst.msk [vmem:[#allocation2 + $0x178] sm:$0x3] %vm203_vm2, %v3501_v1 }
  0x49   : > { %4875 = vst [vmem:[#allocation7_spill] sm:$0xff] %v3704_v16 }
  0x4a   : > { %252 = vst.msk [vmem:[#allocation2 + $0x190] sm:$0x3] %vm203_vm2, %v3501_v1 }
  0x4b   : > { %4876 = vst [vmem:[#allocation8_spill] sm:$0xff] %v3709_v17 }
  0x4c   : > { %255 = vst.msk [vmem:[#allocation2 + $0x1a8] sm:$0x3] %vm203_vm2, %v3501_v1 }
  0x4d   : > { %4877 = vst [vmem:[#allocation9_spill] sm:$0xff] %v3714_v18 }
  0x4e   : > { %304 = vst.msk [vmem:[#allocation2 + $0xc9] sm:$0xff] %vm200_vm1, %v3704_v16 }
  0x4f   : > { %4878 = vst [vmem:[#allocation10_spill] sm:$0xff] %v3719_v19 }
  0x50   : > { %312 = vst.msk [vmem:[#allocation2 + $0x129] sm:$0xff] %vm200_vm1, %v3709_v17 }
  0x51   : > { %4879 = vst [vmem:[#allocation11_spill] sm:$0xff] %v3724_v20 }
  0x52   : > { %297 = vst.msk [vmem:[#allocation2 + $0x79] sm:$0xff] %vm200_vm1, %v3714_v18 }
  0x53   : > { %4880 = vst [vmem:[#allocation12_spill] sm:$0xff] %v3729_v21 }
  0x54   : > { %305 = vst.msk [vmem:[#allocation2 + $0xd9] sm:$0xff] %vm200_vm1, %v3719_v19 }
  0x55   : > { %4881 = vst [vmem:[#allocation13_spill] sm:$0xff] %v3734_v22  ;;  %v408_v26 = vld [vmem:[#allocation2 + $0xc9] sm:$0xff] }
  0x56   : > { %313 = vst.msk [vmem:[#allocation2 + $0x139] sm:$0xff] %vm200_vm1, %v3724_v20  ;;  %2998 = vmatmul.msk.f32.gmra.mxu2 %vm200_vm1, %v408_v26  ;;  %v852_v26 = vld [vmem:[#allocation2 + $0xa] sm:$0xff] }
  0x57   : > { %4882 = vst [vmem:[#allocation14_spill] sm:$0xff] %v3739_v23  ;;  %v416_v28 = vld [vmem:[#allocation2 + $0x129] sm:$0xff] }
  0x58   : > { %298 = vst.msk [vmem:[#allocation2 + $0x81] sm:$0xff] %vm200_vm1, %v3729_v21  ;;  %3006 = vmatmul.msk.f32.gmra.mxu3 %vm200_vm1, %v416_v28 }
  0x59   : > { %4883 = vst [vmem:[#allocation15_spill] sm:$0xff] %v3744_v24  ;;  %v401_v30 = vld [vmem:[#allocation2 + $0x79] sm:$0xff] }
  0x5a   : > { %306 = vst.msk [vmem:[#allocation2 + $0xe1] sm:$0xff] %vm200_vm1, %v3734_v22  ;;  %2991 = vmatmul.msk.f32.gmra.mxu1 %vm200_vm1, %v401_v30 }
  0x5b   : > { %4884 = vst [vmem:[#allocation16_spill] sm:$0xff] %v3749_v25  ;;  %v409_v35 = vld [vmem:[#allocation2 + $0xd9] sm:$0xff] }
  0x5c   : > { %289 = vst.msk [vmem:[#allocation2 + $0x19] sm:$0xff] %vm200_vm1, %v3739_v23 }
  0x5d   : > { %4885 = vst [vmem:[#allocation17_spill] sm:$0xff] %v3754_v27  ;;  %v417_v37 = vld [vmem:[#allocation2 + $0x139] sm:$0xff] }
  0x5e   : > { %314 = vst.msk [vmem:[#allocation2 + $0x141] sm:$0xff] %vm200_vm1, %v3744_v24  ;;  %2999 = vmatmul.msk.f32.gmra.mxu2 %vm200_vm1, %v409_v35 }
  0x5f   : > { %4886 = vst [vmem:[#allocation18_spill] sm:$0xff] %v3760_v29  ;;  %v402_v40 = vld [vmem:[#allocation2 + $0x81] sm:$0xff] }
  0x60   : > { %299 = vst.msk [vmem:[#allocation2 + $0x91] sm:$0xff] %vm200_vm1, %v3749_v25  ;;  %3007 = vmatmul.msk.f32.gmra.mxu3 %vm200_vm1, %v417_v37 }
  0x61   : > { %4887 = vst [vmem:[#allocation19_spill] sm:$0xff] %v3766_v31  ;;  %v410_v48 = vld [vmem:[#allocation2 + $0xe1] sm:$0xff] }
  0x62   : > { %307 = vst.msk [vmem:[#allocation2 + $0xf1] sm:$0xff] %vm200_vm1, %v3754_v27  ;;  %2992 = vmatmul.msk.f32.gmra.mxu1 %vm200_vm1, %v402_v40 }
  0x63   : > { %4888 = vst [vmem:[#allocation20_spill] sm:$0xff] %v3772_v32  ;;  %v393_v38 = vld [vmem:[#allocation2 + $0x19] sm:$0xff] }
  0x64   : > { %290 = vst.msk [vmem:[#allocation2 + $0x21] sm:$0xff] %vm200_vm1, %v3760_v29  ;;  %2983 = vmatmul.msk.f32.gmra.mxu0 %vm200_vm1, %v393_v38  ;;  %v3080_v14 = vld [vmem:[#allocation2 + $0x18] sm:$0xff] }
  0x65   : > { %4889 = vst [vmem:[#allocation21_spill] sm:$0xff] %v3777_v33  ;;  %v418_v50 = vld [vmem:[#allocation2 + $0x141] sm:$0xff] }
  0x66   : > { %315 = vst.msk [vmem:[#allocation2 + $0x151] sm:$0xff] %vm200_vm1, %v3766_v31  ;;  %3000 = vmatmul.msk.f32.gmra.mxu2 %vm200_vm1, %v410_v48 }
  0x67   : > { %4890 = vst [vmem:[#allocation22_spill] sm:$0xff] %v3782_v34  ;;  %v403_v51 = vld [vmem:[#allocation2 + $0x91] sm:$0xff] }
  0x68   : > { %300 = vst.msk [vmem:[#allocation2 + $0x99] sm:$0xff] %vm200_vm1, %v3772_v32  ;;  %3008 = vmatmul.msk.f32.gmra.mxu3 %vm200_vm1, %v418_v50 }
  0x69   : > { %4891 = vst [vmem:[#allocation23_spill] sm:$0xff] %v3787_v36  ;;  %v411_v54 = vld [vmem:[#allocation2 + $0xf1] sm:$0xff] }
  0x6a   : > { %308 = vst.msk [vmem:[#allocation2 + $0xf9] sm:$0xff] %vm200_vm1, %v3777_v33  ;;  %2993 = vmatmul.msk.f32.gmra.mxu1 %vm200_vm1, %v403_v51 }
  0x6b   : > { %4892 = vst [vmem:[#allocation24_spill] sm:$0xff] %v3792_v39  ;;  %v394_v46 = vld [vmem:[#allocation2 + $0x21] sm:$0xff] }
  0x6c   : > { %291 = vst.msk [vmem:[#allocation2 + $0x31] sm:$0xff] %vm200_vm1, %v3782_v34  ;;  %2984 = vmatmul.msk.f32.gmra.mxu0 %vm200_vm1, %v394_v46  ;;  %v3081_v28 = vld [vmem:[#allocation2 + $0x20] sm:$0xff] }
  0x6d   : > { %4893 = vst [vmem:[#allocation25_spill] sm:$0xff] %v3798_v41  ;;  %v419_v55 = vld [vmem:[#allocation2 + $0x151] sm:$0xff]  ;;  %v3902_v30 = vld [vmem:[#allocation2 + $0x1a] sm:$0xff]  ;;  %v3913_v37 = vld [vmem:[#allocation2 + $0x22] sm:$0xff] }
  0x6e   : > { %316 = vst.msk [vmem:[#allocation2 + $0x159] sm:$0xff] %vm200_vm1, %v3787_v36  ;;  %3001 = vmatmul.msk.f32.gmra.mxu2 %vm200_vm1, %v411_v54  ;;  %v3951_v54 = vld [vmem:[#allocation2 + $0x60] sm:$0xff] }
  0x6f   : > { %4894 = vst [vmem:[#allocation26_spill] sm:$0xff] %v3804_v42  ;;  %v404_v56 = vld [vmem:[#allocation2 + $0x99] sm:$0xff] }
  0x70   : > { %301 = vst.msk [vmem:[#allocation2 + $0xa9] sm:$0xff] %vm200_vm1, %v3792_v39  ;;  %3009 = vmatmul.msk.f32.gmra.mxu3 %vm200_vm1, %v419_v55 }
  0x71   : > { %4895 = vst [vmem:[#allocation27_spill] sm:$0xff] %v3810_v43  ;;  %v412_v61 = vld [vmem:[#allocation2 + $0xf9] sm:$0xff] }
  0x72   : > { %309 = vst.msk [vmem:[#allocation2 + $0x109] sm:$0xff] %vm200_vm1, %v3798_v41  ;;  %2994 = vmatmul.msk.f32.gmra.mxu1 %vm200_vm1, %v404_v56 }
  0x73   : > { %4896 = vst [vmem:[#allocation28_spill] sm:$0xff] %v3816_v44  ;;  %v3848_v53 = vld [vmem:[#allocation2 + $0x31] sm:$0xff] }
  0x74   : > { %292 = vst.msk [vmem:[#allocation2 + $0x39] sm:$0xff] %vm200_vm1, %v3804_v42  ;;  %2985 = vmatmul.msk.f32.gmra.mxu0 %vm200_vm1, %v3848_v53  ;;  %v3904_v35 = vld [vmem:[#allocation2 + $0x30] sm:$0xff] }
  0x75   : > { %4897 = vst [vmem:[#allocation29_spill] sm:$0xff] %v3821_v45  ;;  %v420_v62 = vld [vmem:[#allocation2 + $0x159] sm:$0xff] }
  0x76   : > { %317 = vst.msk [vmem:[#allocation2 + $0x169] sm:$0xff] %vm200_vm1, %v3810_v43  ;;  %3002 = vmatmul.msk.f32.gmra.mxu2 %vm200_vm1, %v412_v61 }
  0x77   : > { %4898 = vst [vmem:[#allocation30_spill] sm:$0xff] %v3826_v47  ;;  %v405_v63 = vld [vmem:[#allocation2 + $0xa9] sm:$0xff] }
  0x78   : > { %302 = vst.msk [vmem:[#allocation2 + $0xb1] sm:$0xff] %vm200_vm1, %v3816_v44  ;;  %3010 = vmatmul.msk.f32.gmra.mxu3 %vm200_vm1, %v420_v62  ;;  %v3981_v62 = vld [vmem:[#allocation2 + $0x78] sm:$0xff] }
  0x79   : > { %4899 = vst [vmem:[#allocation31_spill] sm:$0xff] %v3831_v49  ;;  %v413_v3 = vld [vmem:[#allocation2 + $0x109] sm:$0xff] }
  0x7a   : > { %310 = vst.msk [vmem:[#allocation2 + $0x111] sm:$0xff] %vm200_vm1, %v3821_v45  ;;  %2995 = vmatmul.msk.f32.gmra.mxu1 %vm200_vm1, %v405_v63 }
  0x7b   : > { %293 = vst.msk [vmem:[#allocation2 + $0x49] sm:$0xff] %vm200_vm1, %v3826_v47  ;;  %v3867_v60 = vld [vmem:[#allocation2 + $0x39] sm:$0xff] }
  0x7c   : > { %318 = vst.msk [vmem:[#allocation2 + $0x171] sm:$0xff] %vm200_vm1, %v3831_v49  ;;  %2986 = vmatmul.msk.f32.gmra.mxu0 %vm200_vm1, %v3867_v60  ;;  %v3915_v38 = vld [vmem:[#allocation2 + $0x38] sm:$0xff] }
  0x7d   : > { %4900 = vst [vmem:[#allocation32_spill] sm:$0xff] %v3843_v52  ;;  %v421_v4 = vld [vmem:[#allocation2 + $0x169] sm:$0xff]  ;;  %v3925_v40 = vld [vmem:[#allocation2 + $0x32] sm:$0xff]  ;;  %v3937_v48 = vld [vmem:[#allocation2 + $0x3a] sm:$0xff] }
  0x7e   : > { %294 = vst.msk [vmem:[#allocation2 + $0x51] sm:$0xff] %vm200_vm1, %v3843_v52  ;;  %3003 = vmatmul.msk.f32.gmra.mxu2 %vm200_vm1, %v413_v3 }
  0x7f   : > { %v406_v5 = vld [vmem:[#allocation2 + $0xb1] sm:$0xff]  ;;  %4901 = vst [vmem:[#allocation33_spill] sm:$0xff] %v3965_v57 }
  0x80   : > { %3011 = vmatmul.msk.f32.gmra.mxu3 %vm200_vm1, %v421_v4  ;;  %4902 = vst [vmem:[#allocation34_spill] sm:$0xff] %v3981_v62  ;;  %v3997_v4 = vld [vmem:[#allocation2 + $0x6a] sm:$0xff] }
  0x81   : > { %v414_v8 = vld [vmem:[#allocation2 + $0x111] sm:$0xff]  ;;  %4904 = vst [vmem:[#allocation36_spill] sm:$0xff] %v3997_v4 }
  0x82   : > { %v3878_v1 = vld [vmem:[#allocation2 + $0x49] sm:$0xff]  ;;  %2996 = vmatmul.msk.f32.gmra.mxu1 %vm200_vm1, %v406_v5  ;;  %v3999_v5 = vld [vmem:[#allocation2 + $0x80] sm:$0xff] }
  0x83   : > { %v422_v10 = vld [vmem:[#allocation2 + $0x171] sm:$0xff]  ;;  %v3927_v46 = vld [vmem:[#allocation2 + $0x48] sm:$0xff]  ;;  %4905 = vst [vmem:[#allocation37_spill] sm:$0xff] %v3999_v5 }
  0x84   : > { %2987 = vmatmul.msk.f32.gmra.mxu0 %vm200_vm1, %v3878_v1 }
  0x85   : > { %v3885_v6 = vld [vmem:[#allocation2 + $0x51] sm:$0xff] }
  0x86   : > { %3004 = vmatmul.msk.f32.gmra.mxu2 %vm200_vm1, %v414_v8  ;;  %v3939_v50 = vld [vmem:[#allocation2 + $0x50] sm:$0xff] }
  0x87   : > { %v3949_v51 = vld [vmem:[#allocation2 + $0x4a] sm:$0xff]  ;;  %v3963_v56 = vld [vmem:[#allocation2 + $0x52] sm:$0xff] }
  0x88   : > { %3012 = vmatmul.msk.f32.gmra.mxu3 %vm200_vm1, %v422_v10 }
  0x8a   : > { %3014 = vmatmul.msk.f32.vlgmr.msrb.gmra.mxu1 %vm200_vm1, %v358_v12 }
  0x8c   : > { %2988 = vmatmul.msk.f32.gmra.mxu0 %vm200_vm1, %v3885_v6 }
  0x8e   : > { %3048 = vmatmul.msk.f32.vlgmr.msrb.gmra.mxu2 %vm200_vm1, %v851_v13 }
  0x90   : > { %3114 = vmatmul.msk.f32.vlgmr.msrb.gmra.mxu3 %vm200_vm1, %v3080_v14 }
  0x92   : > { %3015 = vmatmul.msk.f32.gmra.mxu1 %vm200_vm1, %v359_v15  ;;  %v4019_v15 = vld [vmem:[#allocation2 + $0x90] sm:$0xff] }
  0x93   : > { %4908 = vst [vmem:[#allocation40_spill] sm:$0xff] %v4019_v15 }
  0x94   : > { %3148 = vmatmul.msk.f32.vlgmr.msrb.gmra.mxu0 %vm200_vm1, %v3739_v23 }
  0x95   : > { %v3971_v58 = vpop.f32.mrf.mxu0 }
  0x96   : > { %3049 = vmatmul.msk.f32.gmra.mxu2 %vm200_vm1, %v852_v26 }
  0x98   : > { %3115 = vmatmul.msk.f32.gmra.mxu3 %vm200_vm1, %v3081_v28 }
  0x99   : > { %v3961_v55 = vpop.f32.mrf.mxu1 }
  0x9a   : > { %3016 = vmatmul.msk.f32.gmra.mxu1 %vm200_vm1, %v3080_v14  ;;  %v4017_v14 = vld [vmem:[#allocation2 + $0x7a] sm:$0xff] }
  0x9b   : > { %4907 = vst [vmem:[#allocation39_spill] sm:$0xff] %v4017_v14 }
  0x9c   : > { %3149 = vmatmul.msk.f32.gmra.mxu0 %vm200_vm1, %v3760_v29  ;;  %v4059_v29 = vld [vmem:[#allocation2 + $0xa8] sm:$0xff] }
  0x9d   : > { %4914 = vst [vmem:[#allocation46_spill] sm:$0xff] %v4059_v29 }
  0x9e   : > { %3050 = vmatmul.msk.f32.gmra.mxu2 %vm200_vm1, %v3902_v30 }
  0xa0   : > { %3116 = vmatmul.msk.f32.gmra.mxu3 %vm200_vm1, %v3904_v35 }
  0xa2   : > { %3017 = vmatmul.msk.f32.gmra.mxu1 %vm200_vm1, %v3081_v28 }
  0xa4   : > { %3150 = vmatmul.msk.f32.gmra.mxu0 %vm200_vm1, %v3782_v34  ;;  %v4057_v34 = vld [vmem:[#allocation2 + $0x92] sm:$0xff] }
  0xa5   : > { %4913 = vst [vmem:[#allocation45_spill] sm:$0xff] %v4057_v34 }
  0xa6   : > { %3051 = vmatmul.msk.f32.gmra.mxu2 %vm200_vm1, %v3913_v37 }
  0xa8   : > { %3117 = vmatmul.msk.f32.gmra.mxu3 %vm200_vm1, %v3915_v38 }
  0xaa   : > { %3018 = vmatmul.msk.f32.gmra.mxu1 %vm200_vm1, %v3904_v35 }
  0xac   : > { %3151 = vmatmul.msk.f32.gmra.mxu0 %vm200_vm1, %v3804_v42 }
  0xae   : > { %3052 = vmatmul.msk.f32.gmra.mxu2 %vm200_vm1, %v3925_v40 }
  0xb0   : > { %3118 = vmatmul.msk.f32.gmra.mxu3 %vm200_vm1, %v3927_v46 }
  0xb2   : > { %3019 = vmatmul.msk.f32.gmra.mxu1 %vm200_vm1, %v3915_v38 }
  0xb4   : > { %3152 = vmatmul.msk.f32.gmra.mxu0 %vm200_vm1, %v3826_v47 }
  0xb6   : > { %3053 = vmatmul.msk.f32.gmra.mxu2 %vm200_vm1, %v3937_v48 }
  0xb8   : > { %3119 = vmatmul.msk.f32.gmra.mxu3 %vm200_vm1, %v3939_v50 }
  0xba   : > { %3020 = vmatmul.msk.f32.gmra.mxu1 %vm200_vm1, %v3927_v46 }
  0xbc   : > { %3153 = vmatmul.msk.f32.gmra.mxu0 %vm200_vm1, %v3843_v52 }
  0xbe   : > { %3054 = vmatmul.msk.f32.gmra.mxu2 %vm200_vm1, %v3949_v51  ;;  %v3979_v61 = vpop.f32.mrf.mxu1 }
  0xbf   : > { %v3995_v3 = vpop.f32.mrf.mxu0 }
  0xc0   : > { %3120 = vmatmul.msk.f32.gmra.mxu3 %vm200_vm1, %v3951_v54  ;;  %v3989_v63 = vpop.f32.mrf.mxu2 }
  0xc2   : > { %3021 = vmatmul.msk.f32.gmra.mxu1 %vm200_vm1, %v3939_v50  ;;  %v3991_v0 = vpop.f32.mrf.mxu3 }
  0xc3   : > { %4903 = vst [vmem:[#allocation35_spill] sm:$0xff] %v3991_v0  ;;  %v4079_v0 = vld [vmem:[#allocation2 + $0xb0] sm:$0xff] }
  0xc4   : > { %3154 = vmatmul.msk.f32.gmra.mxu0 %vm200_vm1, %v3568_v2  ;;  %v4039_v2 = vld [vmem:[#allocation2 + $0x98] sm:$0xff]  ;;  %4918 = vst [vmem:[#allocation50_spill] sm:$0xff] %v4079_v0 }
  0xc5   : > { %4911 = vst [vmem:[#allocation43_spill] sm:$0xff] %v4039_v2 }
  0xc6   : > { %3055 = vmatmul.msk.f32.gmra.mxu2 %vm200_vm1, %v3963_v56 }
  0xc8   : > { %3121 = vmatmul.msk.f32.gmra.mxu3 %vm200_vm1, %v3965_v57 }
  0xca   : > { %3022 = vmatmul.msk.f32.gmra.mxu1 %vm200_vm1, %v3951_v54 }
  0xcc   : > { %3155 = vmatmul.msk.f32.gmra.mxu0 %vm200_vm1, %v3661_v11  ;;  %v4037_v11 = vld [vmem:[#allocation2 + $0x82] sm:$0xff] }
  0xcd   : > { %4910 = vst [vmem:[#allocation42_spill] sm:$0xff] %v4037_v11 }
  0xce   : > { %3056 = vmatmul.msk.f32.gmra.mxu2 %vm200_vm1, %v3977_v59 }
  0xd0   : > { %3122 = vmatmul.msk.f32.gmra.mxu3 %vm200_vm1, %v3981_v62 }
  0xd2   : > { %3023 = vmatmul.msk.f32.gmra.mxu1 %vm200_vm1, %v3965_v57  ;;  %v4146_v57 = vld [vmem:[#allocation2 + $0xca] sm:$0xff] }
  0xd4   : > { %3156 = vmatmul.msk.f32.gmra.mxu0 %vm200_vm1, %v3714_v18 }
  0xd6   : > { %3057 = vmatmul.msk.f32.gmra.mxu2 %vm200_vm1, %v3997_v4 }
  0xd7   : > { %v4001_v8 = vpop.f32.mrf.mxu1 }
  0xd8   : > { %3123 = vmatmul.msk.f32.gmra.mxu3 %vm200_vm1, %v3999_v5 }
  0xd9   : > { %v4011_v10 = vpop.f32.mrf.mxu2 }
  0xda   : > { %3024 = vmatmul.msk.f32.gmra.mxu1 %vm200_vm1, %v3981_v62  ;;  %v4119_v62 = vld [vmem:[#allocation2 + $0xc8] sm:$0xff] }
  0xdb   : > { %v4013_v12 = vpop.f32.mrf.mxu3 }
  0xdc   : > { %3157 = vmatmul.msk.f32.gmra.mxu0 %vm200_vm1, %v3729_v21  ;;  %4906 = vst [vmem:[#allocation38_spill] sm:$0xff] %v4013_v12  ;;  %v4077_v12 = vld [vmem:[#allocation2 + $0x9a] sm:$0xff] }
  0xdd   : > { %4917 = vst [vmem:[#allocation49_spill] sm:$0xff] %v4077_v12 }
  0xde   : > { %3058 = vmatmul.msk.f32.gmra.mxu2 %vm200_vm1, %v4017_v14  ;;  %v4135_v14 = vld [vmem:[#allocation2 + $0xd8] sm:$0xff] }
  0xdf   : > { %v4021_v26 = vpop.f32.mrf.mxu1 }
  0xe0   : > { %3124 = vmatmul.msk.f32.gmra.mxu3 %vm200_vm1, %v4019_v15 }
  0xe1   : > { %v4015_v13 = vpop.f32.mrf.mxu0  ;;  %v4031_v28 = vpop.f32.mrf.mxu2 }
  0xe2   : > { %3025 = vmatmul.msk.f32.gmra.mxu1 %vm200_vm1, %v3999_v5  ;;  %v4099_v5 = vld [vmem:[#allocation2 + $0xc0] sm:$0xff] }
  0xe3   : > { %v4033_v21 = vpop.f32.mrf.mxu3  ;;  %4922 = vst [vmem:[#allocation54_spill] sm:$0xff] %v4099_v5 }
  0xe4   : > { %3158 = vmatmul.msk.f32.gmra.mxu0 %vm200_vm1, %v3749_v25  ;;  %4909 = vst [vmem:[#allocation41_spill] sm:$0xff] %v4033_v21 }
  0xe6   : > { %3059 = vmatmul.msk.f32.gmra.mxu2 %vm200_vm1, %v4037_v11  ;;  %v4117_v11 = vld [vmem:[#allocation2 + $0xb2] sm:$0xff] }
  0xe7   : > { %v4041_v25 = vpop.f32.mrf.mxu1  ;;  %4925 = vst [vmem:[#allocation57_spill] sm:$0xff] %v4117_v11 }
  0xe8   : > { %3125 = vmatmul.msk.f32.gmra.mxu3 %vm200_vm1, %v4039_v2 }
  0xe9   : > { %v4035_v18 = vpop.f32.mrf.mxu0  ;;  %v4051_v52 = vpop.f32.mrf.mxu2 }
  0xea   : > { %3026 = vmatmul.msk.f32.gmra.mxu1 %vm200_vm1, %v4019_v15 }
  0xeb   : > { %v4053_v47 = vpop.f32.mrf.mxu3 }
  0xec   : > { %3159 = vmatmul.msk.f32.gmra.mxu0 %vm200_vm1, %v3772_v32  ;;  %4912 = vst [vmem:[#allocation44_spill] sm:$0xff] %v4053_v47 }
  0xee   : > { %3060 = vmatmul.msk.f32.gmra.mxu2 %vm200_vm1, %v4057_v34  ;;  %v4097_v34 = vld [vmem:[#allocation2 + $0xaa] sm:$0xff] }
  0xef   : > { %v4061_v32 = vpop.f32.mrf.mxu1  ;;  %4921 = vst [vmem:[#allocation53_spill] sm:$0xff] %v4097_v34 }
  0xf0   : > { %3126 = vmatmul.msk.f32.gmra.mxu3 %vm200_vm1, %v4059_v29 }
  0xf1   : > { %v4055_v42 = vpop.f32.mrf.mxu0  ;;  %v4071_v23 = vpop.f32.mrf.mxu2 }
  0xf2   : > { %3027 = vmatmul.msk.f32.gmra.mxu1 %vm200_vm1, %v4039_v2  ;;  %4915 = vst [vmem:[#allocation47_spill] sm:$0xff] %v4071_v23  ;;  %v4148_v23 = vld [vmem:[#allocation2 + $0xe0] sm:$0xff] }
  0xf3   : > { %v4073_v47 = vpop.f32.mrf.mxu3 }
  0xf4   : > { %3160 = vmatmul.msk.f32.gmra.mxu0 %vm200_vm1, %v3792_v39  ;;  %4916 = vst [vmem:[#allocation48_spill] sm:$0xff] %v4073_v47 }
  0xf6   : > { %3061 = vmatmul.msk.f32.gmra.mxu2 %vm200_vm1, %v4077_v12 }
  0xf7   : > { %v4081_v39 = vpop.f32.mrf.mxu1 }
  0xf8   : > { %3127 = vmatmul.msk.f32.gmra.mxu3 %vm200_vm1, %v4079_v0 }
  0xf9   : > { %v4075_v21 = vpop.f32.mrf.mxu0  ;;  %v4091_v47 = vpop.f32.mrf.mxu2 }
  0xfa   : > { %3028 = vmatmul.msk.f32.gmra.mxu1 %vm200_vm1, %v4059_v29  ;;  %4919 = vst [vmem:[#allocation51_spill] sm:$0xff] %v4091_v47 }
  0xfb   : > { %v4093_v2 = vpop.f32.mrf.mxu3 }
  0xfc   : > { %3161 = vmatmul.msk.f32.gmra.mxu0 %vm200_vm1, %v3816_v44  ;;  %4920 = vst [vmem:[#allocation52_spill] sm:$0xff] %v4093_v2 }
  0xfe   : > { %3062 = vmatmul.msk.f32.gmra.mxu2 %vm200_vm1, %v4097_v34 }
  0xff   : > { %v4101_v44 = vpop.f32.mrf.mxu1 }
 0x100   : > { %3128 = vmatmul.msk.f32.gmra.mxu3 %vm200_vm1, %v4099_v5 }
 0x101   : > { %v4095_v15 = vpop.f32.mrf.mxu0  ;;  %v4111_v2 = vpop.f32.mrf.mxu2 }
 0x102   : > { %3029 = vmatmul.msk.f32.gmra.mxu1 %vm200_vm1, %v4079_v0  ;;  %4923 = vst [vmem:[#allocation55_spill] sm:$0xff] %v4111_v2  ;;  %v4133_v2 = vld [vmem:[#allocation2 + $0xc2] sm:$0xff] }
 0x103   : > { %v4113_v29 = vpop.f32.mrf.mxu3  ;;  %4928 = vst [vmem:[#allocation60_spill] sm:$0xff] %v4133_v2 }
 0x104   : > { %3162 = vmatmul.msk.f32.gmra.mxu0 %vm200_vm1, %v3644_v7  ;;  %4924 = vst [vmem:[#allocation56_spill] sm:$0xff] %v4113_v29 }
 0x106   : > { %3063 = vmatmul.msk.f32.gmra.mxu2 %vm200_vm1, %v4117_v11 }
 0x107   : > { %v755_v7 = vpop.f32.mrf.mxu1 }
 0x108   : > { %3129 = vmatmul.msk.f32.gmra.mxu3 %vm200_vm1, %v4119_v62 }
 0x109   : > { %v4115_v12 = vpop.f32.mrf.mxu0  ;;  %v4129_v29 = vpop.f32.mrf.mxu2 }
 0x10a   : > { %3030 = vmatmul.msk.f32.gmra.mxu1 %vm200_vm1, %v4099_v5  ;;  %4926 = vst [vmem:[#allocation58_spill] sm:$0xff] %v4129_v29 }
 0x10b   : > { %v4131_v0 = vpop.f32.mrf.mxu3 }
 0x10c   : > { %3163 = vmatmul.msk.f32.gmra.mxu0 %vm200_vm1, %v3704_v16  ;;  %4927 = vst [vmem:[#allocation59_spill] sm:$0xff] %v4131_v0  ;;  %v756_v16 = vadd.f32 %v755_v7, %v3971_v58 }
 0x10e   : > { %3064 = vmatmul.msk.f32.gmra.mxu2 %vm200_vm1, %v4133_v2 }
 0x10f   : > { %v758_v47 = vpop.f32.mrf.mxu1 }
 0x110   : > { %3130 = vmatmul.msk.f32.gmra.mxu3 %vm200_vm1, %v4135_v14  ;;  %v759_v7 = vadd.f32 %v758_v47, %v3995_v3 }
 0x111   : > { %v1528_v34 = vpop.f32.mrf.mxu0  ;;  %v1001_v0 = vpop.f32.mrf.mxu2 }
 0x112   : > { %3031 = vmatmul.msk.f32.gmra.mxu1 %vm200_vm1, %v4119_v62  ;;  %v1097_v5 = vadd.f32 %v1001_v0, %v756_v16 }
 0x113   : > { %v1282_v11 = vpop.f32.mrf.mxu3 }
 0x114   : > { %3164 = vmatmul.msk.f32.gmra.mxu0 %vm200_vm1, %v3719_v19  ;;  %v1378_v4 = vadd.f32 %v1282_v11, %v1097_v5  ;;  %v4161_v5 = vld [vmem:[#allocation2 + $0xda] sm:$0xff] }
 0x116   : > { %v4152_v2 = vadd.f32 %v1528_v34, %v1378_v4  ;;  %3065 = vmatmul.msk.f32.gmra.mxu2 %vm200_vm1, %v4146_v57  ;;  %v4163_v34 = vld [vmem:[#allocation2 + $0xf0] sm:$0xff] }
 0x117   : > { %v761_v19 = vpop.f32.mrf.mxu1 }
 0x118   : > { %4929 = vst [vmem:[#allocation61_spill] sm:$0xff] %v4152_v2  ;;  %3131 = vmatmul.msk.f32.gmra.mxu3 %vm200_vm1, %v4148_v23  ;;  %v762_v47 = vadd.f32 %v761_v19, %v4015_v13 }
 0x119   : > { %v1531_v29 = vpop.f32.mrf.mxu0  ;;  %v1004_v11 = vpop.f32.mrf.mxu2 }
 0x11a   : > { %3032 = vmatmul.msk.f32.gmra.mxu1 %vm200_vm1, %v4135_v14  ;;  %v1098_v16 = vadd.f32 %v1004_v11, %v759_v7 }
 0x11b   : > { %v1285_v58 = vpop.f32.mrf.mxu3 }
 0x11c   : > { %3165 = vmatmul.msk.f32.gmra.mxu0 %vm200_vm1, %v3734_v22  ;;  %v1379_v22 = vadd.f32 %v1285_v58, %v1098_v16  ;;  %v4176_v58 = vld [vmem:[#allocation2 + $0xe2] sm:$0xff] }
 0x11e   : > { %v4167_v2 = vadd.f32 %v1531_v29, %v1379_v22  ;;  %3066 = vmatmul.msk.f32.gmra.mxu2 %vm200_vm1, %v4161_v5  ;;  %v4178_v22 = vld [vmem:[#allocation2 + $0xf8] sm:$0xff] }
 0x11f   : > { %v764_v4 = vpop.f32.mrf.mxu1 }
 0x120   : > { %4930 = vst [vmem:[#allocation62_spill] sm:$0xff] %v4167_v2  ;;  %3132 = vmatmul.msk.f32.gmra.mxu3 %vm200_vm1, %v4163_v34  ;;  %v765_v19 = vadd.f32 %v764_v4, %v4035_v18 }
 0x121   : > { %v1534_v0 = vpop.f32.mrf.mxu0  ;;  %v1007_v3 = vpop.f32.mrf.mxu2 }
 0x122   : > { %3033 = vmatmul.msk.f32.gmra.mxu1 %vm200_vm1, %v4148_v23  ;;  %v1099_v7 = vadd.f32 %v1007_v3, %v762_v47 }
 0x123   : > { %v1288_v11 = vpop.f32.mrf.mxu3 }
 0x124   : > { %3166 = vmatmul.msk.f32.gmra.mxu0 %vm200_vm1, %v3754_v27  ;;  %v1380_v27 = vadd.f32 %v1288_v11, %v1099_v7  ;;  %v4191_v11 = vld [vmem:[#allocation2 + $0xf2] sm:$0xff] }
 0x126   : > { %v4182_v2 = vadd.f32 %v1534_v0, %v1380_v27  ;;  %3067 = vmatmul.msk.f32.gmra.mxu2 %vm200_vm1, %v4176_v58  ;;  %v4193_v27 = vld [vmem:[#allocation2 + $0x108] sm:$0xff] }
 0x127   : > { %v767_v29 = vpop.f32.mrf.mxu1 }
 0x128   : > { %4931 = vst [vmem:[#allocation63_spill] sm:$0xff] %v4182_v2  ;;  %3133 = vmatmul.msk.f32.gmra.mxu3 %vm200_vm1, %v4178_v22  ;;  %v768_v18 = vadd.f32 %v767_v29, %v4055_v42 }
 0x129   : > { %v1537_v16 = vpop.f32.mrf.mxu0  ;;  %v1010_v13 = vpop.f32.mrf.mxu2 }
 0x12a   : > { %3034 = vmatmul.msk.f32.gmra.mxu1 %vm200_vm1, %v4163_v34  ;;  %v1100_v47 = vadd.f32 %v1010_v13, %v765_v19 }
 0x12b   : > { %v1291_v3 = vpop.f32.mrf.mxu3 }
 0x12c   : > { %3167 = vmatmul.msk.f32.gmra.mxu0 %vm200_vm1, %v3777_v33  ;;  %v1381_v33 = vadd.f32 %v1291_v3, %v1100_v47  ;;  %v4206_v3 = vld [vmem:[#allocation2 + $0xfa] sm:$0xff] }
 0x12e   : > { %v4197_v2 = vadd.f32 %v1537_v16, %v1381_v33  ;;  %3068 = vmatmul.msk.f32.gmra.mxu2 %vm200_vm1, %v4191_v11  ;;  %v4208_v33 = vld [vmem:[#allocation2 + $0x110] sm:$0xff] }
 0x12f   : > { %v770_v0 = vpop.f32.mrf.mxu1 }
 0x130   : > { %4932 = vst [vmem:[#allocation64_spill] sm:$0xff] %v4197_v2  ;;  %3134 = vmatmul.msk.f32.gmra.mxu3 %vm200_vm1, %v4193_v27  ;;  %v771_v42 = vadd.f32 %v770_v0, %v4075_v21 }
 0x131   : > { %v1540_v7 = vpop.f32.mrf.mxu0  ;;  %v1013_v4 = vpop.f32.mrf.mxu2 }
 0x132   : > { %3035 = vmatmul.msk.f32.gmra.mxu1 %vm200_vm1, %v4178_v22  ;;  %v1101_v19 = vadd.f32 %v1013_v4, %v768_v18 }
 0x133   : > { %v1294_v13 = vpop.f32.mrf.mxu3 }
 0x134   : > { %3168 = vmatmul.msk.f32.gmra.mxu0 %vm200_vm1, %v3798_v41  ;;  %v1382_v41 = vadd.f32 %v1294_v13, %v1101_v19  ;;  %v4221_v13 = vld [vmem:[#allocation2 + $0x10a] sm:$0xff] }
 0x136   : > { %v4212_v2 = vadd.f32 %v1540_v7, %v1382_v41  ;;  %3069 = vmatmul.msk.f32.gmra.mxu2 %vm200_vm1, %v4206_v3  ;;  %v4223_v41 = vld [vmem:[#allocation2 + $0x120] sm:$0xff] }
 0x137   : > { %v773_v16 = vpop.f32.mrf.mxu1 }
 0x138   : > { %4933 = vst [vmem:[#allocation65_spill] sm:$0xff] %v4212_v2  ;;  %3135 = vmatmul.msk.f32.gmra.mxu3 %vm200_vm1, %v4208_v33  ;;  %v774_v21 = vadd.f32 %v773_v16, %v4095_v15 }
 0x139   : > { %v1543_v47 = vpop.f32.mrf.mxu0  ;;  %v1016_v29 = vpop.f32.mrf.mxu2 }
 0x13a   : > { %3036 = vmatmul.msk.f32.gmra.mxu1 %vm200_vm1, %v4193_v27  ;;  %v1102_v18 = vadd.f32 %v1016_v29, %v771_v42 }
 0x13b   : > { %v1297_v4 = vpop.f32.mrf.mxu3 }
 0x13c   : > { %3169 = vmatmul.msk.f32.gmra.mxu0 %vm200_vm1, %v3821_v45  ;;  %v1383_v45 = vadd.f32 %v1297_v4, %v1102_v18  ;;  %v4236_v4 = vld [vmem:[#allocation2 + $0x112] sm:$0xff] }
 0x13e   : > { %v4227_v2 = vadd.f32 %v1543_v47, %v1383_v45  ;;  %3070 = vmatmul.msk.f32.gmra.mxu2 %vm200_vm1, %v4221_v13  ;;  %v4238_v45 = vld [vmem:[#allocation2 + $0x128] sm:$0xff] }
 0x13f   : > { %v776_v7 = vpop.f32.mrf.mxu1 }
 0x140   : > { %4934 = vst [vmem:[#allocation66_spill] sm:$0xff] %v4227_v2  ;;  %3136 = vmatmul.msk.f32.gmra.mxu3 %vm200_vm1, %v4223_v41  ;;  %v777_v15 = vadd.f32 %v776_v7, %v4115_v12 }
 0x141   : > { %v1546_v19 = vpop.f32.mrf.mxu0  ;;  %v1019_v0 = vpop.f32.mrf.mxu2 }
 0x142   : > { %3037 = vmatmul.msk.f32.gmra.mxu1 %vm200_vm1, %v4208_v33  ;;  %v1103_v42 = vadd.f32 %v1019_v0, %v774_v21 }
 0x143   : > { %v1300_v29 = vpop.f32.mrf.mxu3 }
 0x144   : > { %3170 = vmatmul.msk.f32.gmra.mxu0 %vm200_vm1, %v3649_v9  ;;  %v1384_v9 = vadd.f32 %v1300_v29, %v1103_v42  ;;  %v4251_v29 = vld [vmem:[#allocation2 + $0x122] sm:$0xff] }
 0x146   : > { %v4242_v2 = vadd.f32 %v1546_v19, %v1384_v9  ;;  %3071 = vmatmul.msk.f32.gmra.mxu2 %vm200_vm1, %v4236_v4  ;;  %v4253_v9 = vld [vmem:[#allocation2 + $0x138] sm:$0xff] }
 0x147   : > { %v779_v47 = vpop.f32.mrf.mxu1  ;;  %4936 = vst [vmem:[#allocation68_spill] sm:$0xff] %v4253_v9 }
 0x148   : > { %4935 = vst [vmem:[#allocation67_spill] sm:$0xff] %v4242_v2  ;;  %3137 = vmatmul.msk.f32.gmra.mxu3 %vm200_vm1, %v4238_v45  ;;  %v780_v12 = vadd.f32 %v779_v47, %v3961_v55  ;;  %v4279_v55 = vld [vmem:[%s3563_s21 + $0xf0] sm:$0xff] }
 0x149   : > { %v1549_v18 = vpop.f32.mrf.mxu0  ;;  %v1022_v16 = vpop.f32.mrf.mxu2  ;;  %4940 = vst [vmem:[#allocation72_spill] sm:$0xff] %v4279_v55 }
 0x14a   : > { %3038 = vmatmul.msk.f32.gmra.mxu1 %vm200_vm1, %v4223_v41  ;;  %v1104_v21 = vadd.f32 %v1022_v16, %v777_v15  ;;  %319 = vst.msk [vmem:[#allocation2 + $0x181] sm:$0xff] %vm200_vm1, %v4279_v55 }
 0x14b   : > { %v1303_v0 = vpop.f32.mrf.mxu3 }
 0x14c   : > { %3171 = vmatmul.msk.f32.gmra.mxu0 %vm200_vm1, %v3709_v17  ;;  %v1385_v17 = vadd.f32 %v1303_v0, %v1104_v21  ;;  %v4266_v0 = vld [vmem:[#allocation2 + $0x12a] sm:$0xff] }
 0x14e   : > { %v4257_v2 = vadd.f32 %v1549_v18, %v1385_v17  ;;  %3072 = vmatmul.msk.f32.gmra.mxu2 %vm200_vm1, %v4251_v29  ;;  %v4268_v18 = vld [vmem:[#allocation2 + $0x140] sm:$0xff] }
 0x14f   : > { %v782_v19 = vpop.f32.mrf.mxu1  ;;  %4938 = vst [vmem:[#allocation70_spill] sm:$0xff] %v4268_v18 }
 0x150   : > { %4937 = vst [vmem:[#allocation69_spill] sm:$0xff] %v4257_v2  ;;  %3138 = vmatmul.msk.f32.gmra.mxu3 %vm200_vm1, %v4253_v9  ;;  %v783_v47 = vadd.f32 %v782_v19, %v3979_v61  ;;  %v4299_v19 = vld [vmem:[%s3563_s21 + $0xf8] sm:$0xff] }
 0x151   : > { %v1552_v42 = vpop.f32.mrf.mxu0  ;;  %v1025_v7 = vpop.f32.mrf.mxu2  ;;  %320 = vst.msk [vmem:[#allocation2 + $0x189] sm:$0xff] %vm200_vm1, %v4299_v19 }
 0x152   : > { %3039 = vmatmul.msk.f32.gmra.mxu1 %vm200_vm1, %v4238_v45  ;;  %v1105_v15 = vadd.f32 %v1025_v7, %v780_v12 }
 0x153   : > { %v1306_v16 = vpop.f32.mrf.mxu3 }
 0x154   : > { %3172 = vmatmul.msk.f32.gmra.mxu0 %vm200_vm1, %v3724_v20  ;;  %v1386_v17 = vadd.f32 %v1306_v16, %v1105_v15  ;;  %v4286_v16 = vld [vmem:[#allocation2 + $0x13a] sm:$0xff] }
 0x156   : > { %v4272_v2 = vadd.f32 %v1552_v42, %v1386_v17  ;;  %3073 = vmatmul.msk.f32.gmra.mxu2 %vm200_vm1, %v4266_v0 }
 0x157   : > { %v785_v20 = vpop.f32.mrf.mxu1 }
 0x158   : > { %4939 = vst [vmem:[#allocation71_spill] sm:$0xff] %v4272_v2  ;;  %3139 = vmatmul.msk.f32.gmra.mxu3 %vm200_vm1, %v4268_v18 }
 0x159   : > { %v1555_v21 = vpop.f32.mrf.mxu0  ;;  %v1028_v12 = vpop.f32.mrf.mxu2 }
 0x15a   : > { %3040 = vmatmul.msk.f32.gmra.mxu1 %vm200_vm1, %v4253_v9  ;;  %v1106_v42 = vadd.f32 %v1028_v12, %v783_v47  ;;  %v786_v47 = vadd.f32 %v785_v20, %v4001_v8 }
 0x15b   : > { %v1309_v7 = vpop.f32.mrf.mxu3 }
 0x15c   : > { %3173 = vmatmul.msk.f32.gmra.mxu0 %vm200_vm1, %v3744_v24  ;;  %v1387_v17 = vadd.f32 %v1309_v7, %v1106_v42  ;;  %v4288_v24 = vld [vmem:[#allocation2 + $0x150] sm:$0xff] }
 0x15d   : > { %4941 = vst [vmem:[#allocation73_spill] sm:$0xff] %v4288_v24 }
 0x15e   : > { %v4292_v61 = vadd.f32 %v1555_v21, %v1387_v17  ;;  %3074 = vmatmul.msk.f32.gmra.mxu2 %vm200_vm1, %v4286_v16  ;;  %v4306_v17 = vld [vmem:[#allocation2 + $0x142] sm:$0xff] }
 0x15f   : > { %v788_v2 = vpop.f32.mrf.mxu1 }
 0x160   : > { %4942 = vst [vmem:[#allocation74_spill] sm:$0xff] %v4292_v61  ;;  %3140 = vmatmul.msk.f32.gmra.mxu3 %vm200_vm1, %v4288_v24  ;;  %v4308_v61 = vld [vmem:[#allocation2 + $0x158] sm:$0xff]  ;;  %v789_v8 = vadd.f32 %v788_v2, %v4021_v26 }
 0x161   : > { %v1558_v15 = vpop.f32.mrf.mxu0  ;;  %v1031_v12 = vpop.f32.mrf.mxu2  ;;  %4943 = vst [vmem:[#allocation75_spill] sm:$0xff] %v4308_v61 }
 0x162   : > { %3041 = vmatmul.msk.f32.gmra.mxu1 %vm200_vm1, %v4268_v18  ;;  %v1107_v42 = vadd.f32 %v1031_v12, %v786_v47  ;;  %v4321_v18 = vld [vmem:[#allocation2 + $0x152] sm:$0xff] }
 0x163   : > { %v1312_v21 = vpop.f32.mrf.mxu3 }
 0x164   : > { %3174 = vmatmul.msk.f32.gmra.mxu0 %vm200_vm1, %v3766_v31  ;;  %v1388_v31 = vadd.f32 %v1312_v21, %v1107_v42 }
 0x166   : > { %v4312_v20 = vadd.f32 %v1558_v15, %v1388_v31  ;;  %3075 = vmatmul.msk.f32.gmra.mxu2 %vm200_vm1, %v4306_v17  ;;  %v3108_v31 = vld [vmem:[#allocation2 + $0x168] sm:$0xff] }
 0x167   : > { %v791_v9 = vpop.f32.mrf.mxu1 }
 0x168   : > { %4944 = vst [vmem:[#allocation76_spill] sm:$0xff] %v4312_v20  ;;  %3141 = vmatmul.msk.f32.gmra.mxu3 %vm200_vm1, %v4308_v61  ;;  %v792_v2 = vadd.f32 %v791_v9, %v4041_v25 }
 0x169   : > { %v1561_v7 = vpop.f32.mrf.mxu0  ;;  %v1034_v47 = vpop.f32.mrf.mxu2 }
 0x16a   : > { %3042 = vmatmul.msk.f32.gmra.mxu1 %vm200_vm1, %v4288_v24  ;;  %v1108_v12 = vadd.f32 %v1034_v47, %v789_v8 }
 0x16b   : > { %v1315_v42 = vpop.f32.mrf.mxu3 }
 0x16c   : > { %3175 = vmatmul.msk.f32.gmra.mxu0 %vm200_vm1, %v3787_v36  ;;  %v1389_v36 = vadd.f32 %v1315_v42, %v1108_v12  ;;  %v4333_v42 = vld [vmem:[#allocation2 + $0x15a] sm:$0xff] }
 0x16e   : > { %v4325_v20 = vadd.f32 %v1561_v7, %v1389_v36  ;;  %3076 = vmatmul.msk.f32.gmra.mxu2 %vm200_vm1, %v4321_v18 }
 0x16f   : > { %v794_v15 = vpop.f32.mrf.mxu1 }
 0x170   : > { %4945 = vst [vmem:[#allocation77_spill] sm:$0xff] %v4325_v20  ;;  %3142 = vmatmul.msk.f32.gmra.mxu3 %vm200_vm1, %v3108_v31  ;;  %v795_v25 = vadd.f32 %v794_v15, %v4061_v32 }
 0x171   : > { %v1564_v21 = vpop.f32.mrf.mxu0  ;;  %v1037_v26 = vpop.f32.mrf.mxu2 }
 0x172   : > { %3043 = vmatmul.msk.f32.gmra.mxu1 %vm200_vm1, %v4308_v61  ;;  %v1109_v8 = vadd.f32 %v1037_v26, %v792_v2  ;;  %v3110_v61 = vld [vmem:[#allocation2 + $0x180] sm:$0xff] }
 0x173   : > { %v1318_v47 = vpop.f32.mrf.mxu3 }
 0x174   : > { %3176 = vmatmul.msk.f32.gmra.mxu0 %vm200_vm1, %v3810_v43  ;;  %v1390_v24 = vadd.f32 %v1318_v47, %v1109_v8  ;;  %v3109_v43 = vld [vmem:[#allocation2 + $0x170] sm:$0xff] }
 0x175   : > { %v4344_v47 = vld [vmem:[#allocation2 + $0x16a] sm:$0xff] }
 0x176   : > { %v4337_v7 = vadd.f32 %v1564_v21, %v1390_v24  ;;  %3077 = vmatmul.msk.f32.gmra.mxu2 %vm200_vm1, %v4333_v42 }
 0x177   : > { %v797_v36 = vpop.f32.mrf.mxu1 }
 0x178   : > { %3143 = vmatmul.msk.f32.gmra.mxu3 %vm200_vm1, %v3109_v43  ;;  %v798_v32 = vadd.f32 %v797_v36, %v4081_v39 }
 0x179   : > { %v1567_v12 = vpop.f32.mrf.mxu0  ;;  %v1040_v9 = vpop.f32.mrf.mxu2 }
 0x17a   : > { %3044 = vmatmul.msk.f32.gmra.mxu1 %vm200_vm1, %v3108_v31  ;;  %v1110_v2 = vadd.f32 %v1040_v9, %v795_v25  ;;  %v4355_v9 = vld [vmem:[#allocation2 + $0x172] sm:$0xff] }
 0x17b   : > { %v1321_v26 = vpop.f32.mrf.mxu3 }
 0x17c   : > { %3177 = vmatmul.msk.f32.gmra.mxu0 %vm200_vm1, %v3831_v49  ;;  %v1391_v20 = vadd.f32 %v1321_v26, %v1110_v2  ;;  %v3111_v26 = vld [vmem:[#allocation2 + $0x188] sm:$0xff] }
 0x17e   : > { %v4348_v24 = vadd.f32 %v1567_v12, %v1391_v20  ;;  %3078 = vmatmul.msk.f32.gmra.mxu2 %vm200_vm1, %v4344_v47 }
 0x17f   : > { %v800_v49 = vpop.f32.mrf.mxu1 }
 0x180   : > { %3144 = vmatmul.msk.f32.gmra.mxu3 %vm200_vm1, %v3110_v61  ;;  %v801_v39 = vadd.f32 %v800_v49, %v4101_v44 }
 0x181   : > { %v1570_v8 = vpop.f32.mrf.mxu0  ;;  %v1043_v21 = vpop.f32.mrf.mxu2 }
 0x182   : > { %3045 = vmatmul.msk.f32.gmra.mxu1 %vm200_vm1, %v3109_v43  ;;  %v1111_v31 = vadd.f32 %v1043_v21, %v798_v32 }
 0x183   : > { %v1324_v15 = vpop.f32.mrf.mxu3 }
 0x184   : > { %3178 = vmatmul.msk.f32.gmra.mxu0 %vm200_vm1, %v4279_v55  ;;  %v1392_v2 = vadd.f32 %v1324_v15, %v1111_v31 }
 0x186   : > { %v4359_v20 = vadd.f32 %v1570_v8, %v1392_v2  ;;  %3079 = vmatmul.msk.f32.gmra.mxu2 %vm200_vm1, %v4355_v9 }
 0x187   : > { %v803_v55 = vpop.f32.mrf.mxu1 }
 0x188   : > { %3145 = vmatmul.msk.f32.gmra.mxu3 %vm200_vm1, %v3111_v26  ;;  %v804_v44 = vadd.f32 %v803_v55, %v3989_v63 }
 0x189   : > { %v1573_v25 = vpop.f32.mrf.mxu0  ;;  %v1046_v43 = vpop.f32.mrf.mxu2 }
 0x18a   : > { %3214 = vmatmul.msk.f32.vlgmr.msra.gmra.mxu1 %vm200_vm1, %v3902_v30  ;;  %v1112_v61 = vadd.f32 %v1046_v43, %v801_v39 }
 0x18b   : > { %v1327_v12 = vpop.f32.mrf.mxu3 }
 0x18c   : > { %3179 = vmatmul.msk.f32.gmra.mxu0 %vm200_vm1, %v4299_v19  ;;  %v1393_v32 = vadd.f32 %v1327_v12, %v1112_v61 }
 0x18e   : > { %v4369_v8 = vadd.f32 %v1573_v25, %v1393_v32  ;;  %3280 = vmatmul.msk.f32.vlgmr.msra.gmra.mxu2 %vm200_vm1, %v3904_v35 }
 0x18f   : > { %v806_v21 = vpop.f32.mrf.mxu1 }
 0x190   : > { %3346 = vmatmul.msk.f32.vlgmr.msra.gmra.mxu3 %vm200_vm1, %v3848_v53  ;;  %v807_v53 = vadd.f32 %v806_v21, %v4011_v10 }
 0x191   : > { %v1576_v36 = vpop.f32.mrf.mxu0  ;;  %v1049_v49 = vpop.f32.mrf.mxu2 }
 0x192   : > { %3215 = vmatmul.msk.f32.gmra.mxu1 %vm200_vm1, %v3913_v37  ;;  %v1113_v30 = vadd.f32 %v1049_v49, %v804_v44 }
 0x193   : > { %v1330_v31 = vpop.f32.mrf.mxu3 }
 0x194   : > { %3412 = vmatmul.msk.f32.vlgmr.msra.gmra.mxu0 %vm200_vm1, %v3925_v40  ;;  %v1394_v2 = vadd.f32 %v1330_v31, %v1113_v30  ;;  %v3316_v30 = vld [vmem:[#allocation2 + $0x61] sm:$0xff] }
 0x196   : > { %v4380_v25 = vadd.f32 %v1576_v36, %v1394_v2  ;;  %3281 = vmatmul.msk.f32.gmra.mxu2 %vm200_vm1, %v3915_v38 }
 0x197   : > { %v809_v26 = vpop.f32.mrf.mxu1 }
 0x198   : > { %3347 = vmatmul.msk.f32.gmra.mxu3 %vm200_vm1, %v3867_v60  ;;  %v810_v60 = vadd.f32 %v809_v26, %v4031_v28 }
 0x199   : > { %v1579_v15 = vpop.f32.mrf.mxu0  ;;  %v1052_v35 = vpop.f32.mrf.mxu2 }
 0x19a   : > { %3216 = vmatmul.msk.f32.gmra.mxu1 %vm200_vm1, %v3925_v40  ;;  %v1114_v37 = vadd.f32 %v1052_v35, %v807_v53  ;;  %v3317_v35 = vld [vmem:[#allocation2 + $0x69] sm:$0xff] }
 0x19b   : > { %v1333_v63 = vpop.f32.mrf.mxu3 }
 0x19c   : > { %3413 = vmatmul.msk.f32.gmra.mxu0 %vm200_vm1, %v3937_v48  ;;  %v1395_v39 = vadd.f32 %v1333_v63, %v1114_v37  ;;  %v4947_v63 = vld [vmem:[#allocation36_spill] sm:$0xff] }
 0x19e   : > { %v4391_v61 = vadd.f32 %v1579_v15, %v1395_v39  ;;  %3282 = vmatmul.msk.f32.gmra.mxu2 %vm200_vm1, %v3927_v46  ;;  %v4949_v39 = vld [vmem:[#allocation51_spill] sm:$0xff] }
 0x19f   : > { %v812_v43 = vpop.f32.mrf.mxu1 }
 0x1a0   : > { %3348 = vmatmul.msk.f32.gmra.mxu3 %vm200_vm1, %v3878_v1  ;;  %v813_v1 = vadd.f32 %v812_v43, %v4051_v52  ;;  %v4946_v52 = vld [vmem:[#allocation47_spill] sm:$0xff] }
 0x1a1   : > { %v1582_v55 = vpop.f32.mrf.mxu0  ;;  %v1055_v38 = vpop.f32.mrf.mxu2 }
 0x1a2   : > { %3217 = vmatmul.msk.f32.gmra.mxu1 %vm200_vm1, %v3937_v48  ;;  %v1115_v40 = vadd.f32 %v1055_v38, %v810_v60 }
 0x1a3   : > { %v1336_v10 = vpop.f32.mrf.mxu3 }
 0x1a4   : > { %3414 = vmatmul.msk.f32.gmra.mxu0 %vm200_vm1, %v3949_v51  ;;  %v1396_v36 = vadd.f32 %v1336_v10, %v1115_v40 }
 0x1a6   : > { %v4402_v21 = vadd.f32 %v1582_v55, %v1396_v36  ;;  %3283 = vmatmul.msk.f32.gmra.mxu2 %vm200_vm1, %v3939_v50 }
 0x1a7   : > { %v815_v32 = vpop.f32.mrf.mxu1 }
 0x1a8   : > { %3349 = vmatmul.msk.f32.gmra.mxu3 %vm200_vm1, %v3885_v6  ;;  %v816_v6 = vadd.f32 %v815_v32, %v4946_v52  ;;  %v4950_v32 = vld [vmem:[#allocation39_spill] sm:$0xff]  ;;  %v3319_v52 = vld [vmem:[#allocation2 + $0x81] sm:$0xff] }
 0x1a9   : > { %v1585_v12 = vpop.f32.mrf.mxu0  ;;  %v1058_v46 = vpop.f32.mrf.mxu2 }
 0x1aa   : > { %3218 = vmatmul.msk.f32.gmra.mxu1 %vm200_vm1, %v3949_v51  ;;  %v1116_v48 = vadd.f32 %v1058_v46, %v813_v1  ;;  %v4951_v46 = vld [vmem:[#allocation34_spill] sm:$0xff] }
 0x1ab   : > { %v1339_v28 = vpop.f32.mrf.mxu3 }
 0x1ac   : > { %3415 = vmatmul.msk.f32.gmra.mxu0 %vm200_vm1, %v3963_v56  ;;  %v1397_v49 = vadd.f32 %v1339_v28, %v1116_v48  ;;  %v4952_v48 = vld [vmem:[#allocation55_spill] sm:$0xff] }
 0x1ae   : > { %v4413_v15 = vadd.f32 %v1585_v12, %v1397_v49  ;;  %3284 = vmatmul.msk.f32.gmra.mxu2 %vm200_vm1, %v3951_v54  ;;  %v4948_v54 = vld [vmem:[#allocation33_spill] sm:$0xff] }
 0x1af   : > { %v818_v31 = vpop.f32.mrf.mxu1  ;;  %v3318_v12 = vld [vmem:[#allocation2 + $0x79] sm:$0xff] }
 0x1b0   : > { %3350 = vmatmul.msk.f32.gmra.mxu3 %vm200_vm1, %v3316_v30  ;;  %v819_v43 = vadd.f32 %v818_v31, %v4949_v39 }
 0x1b1   : > { %v1588_v44 = vpop.f32.mrf.mxu0  ;;  %v1061_v50 = vpop.f32.mrf.mxu2 }
 0x1b2   : > { %3219 = vmatmul.msk.f32.gmra.mxu1 %vm200_vm1, %v3963_v56  ;;  %v1117_v51 = vadd.f32 %v1061_v50, %v816_v6  ;;  %v4953_v50 = vld [vmem:[#allocation42_spill] sm:$0xff] }
 0x1b3   : > { %v1342_v2 = vpop.f32.mrf.mxu3 }
 0x1b4   : > { %3416 = vmatmul.msk.f32.gmra.mxu0 %vm200_vm1, %v3977_v59  ;;  %v1398_v53 = vadd.f32 %v1342_v2, %v1117_v51  ;;  %v4954_v2 = vld [vmem:[#allocation37_spill] sm:$0xff] }
 0x1b6   : > { %v4423_v55 = vadd.f32 %v1588_v44, %v1398_v53  ;;  %3285 = vmatmul.msk.f32.gmra.mxu2 %vm200_vm1, %v4948_v54 }
 0x1b7   : > { %v821_v37 = vpop.f32.mrf.mxu1 }
 0x1b8   : > { %3351 = vmatmul.msk.f32.gmra.mxu3 %vm200_vm1, %v3317_v35  ;;  %v822_v28 = vadd.f32 %v821_v37, %v4952_v48 }
 0x1b9   : > { %v1591_v26 = vpop.f32.mrf.mxu0  ;;  %v1064_v56 = vpop.f32.mrf.mxu2 }
 0x1ba   : > { %3220 = vmatmul.msk.f32.gmra.mxu1 %vm200_vm1, %v3977_v59  ;;  %v1118_v60 = vadd.f32 %v1064_v56, %v819_v43  ;;  %v3320_v43 = vld [vmem:[#allocation2 + $0x91] sm:$0xff] }
 0x1bb   : > { %v1345_v38 = vpop.f32.mrf.mxu3 }
 0x1bc   : > { %3417 = vmatmul.msk.f32.gmra.mxu0 %vm200_vm1, %v4947_v63  ;;  %v1399_v10 = vadd.f32 %v1345_v38, %v1118_v60  ;;  %v4956_v60 = vld [vmem:[#allocation45_spill] sm:$0xff] }
 0x1be   : > { %v4433_v1 = vadd.f32 %v1591_v26, %v1399_v10  ;;  %3286 = vmatmul.msk.f32.gmra.mxu2 %vm200_vm1, %v4951_v46  ;;  %v4955_v26 = vld [vmem:[#allocation58_spill] sm:$0xff]  ;;  %v4958_v10 = vld [vmem:[#allocation35_spill] sm:$0xff] }
 0x1bf   : > { %v824_v36 = vpop.f32.mrf.mxu1 }
 0x1c0   : > { %3352 = vmatmul.msk.f32.gmra.mxu3 %vm200_vm1, %v3318_v12  ;;  %v825_v53 = vadd.f32 %v824_v36, %v4955_v26 }
 0x1c1   : > { %v1594_v40 = vpop.f32.mrf.mxu0  ;;  %v1067_v59 = vpop.f32.mrf.mxu2 }
 0x1c2   : > { %3221 = vmatmul.msk.f32.gmra.mxu1 %vm200_vm1, %v4947_v63  ;;  %v1119_v44 = vadd.f32 %v1067_v59, %v822_v28  ;;  %v3321_v59 = vld [vmem:[#allocation2 + $0x99] sm:$0xff] }
 0x1c3   : > { %v1348_v49 = vpop.f32.mrf.mxu3 }
 0x1c4   : > { %3418 = vmatmul.msk.f32.gmra.mxu0 %vm200_vm1, %v4950_v32  ;;  %v1400_v31 = vadd.f32 %v1348_v49, %v1119_v44  ;;  %v4959_v49 = vld [vmem:[#allocation49_spill] sm:$0xff] }
 0x1c6   : > { %v4443_v51 = vadd.f32 %v1594_v40, %v1400_v31  ;;  %3287 = vmatmul.msk.f32.gmra.mxu2 %vm200_vm1, %v4954_v2  ;;  %v4957_v40 = vld [vmem:[#allocation40_spill] sm:$0xff]  ;;  %v4960_v31 = vld [vmem:[#allocation43_spill] sm:$0xff] }
 0x1c7   : > { %v827_v6 = vpop.f32.mrf.mxu1 }
 0x1c8   : > { %3353 = vmatmul.msk.f32.gmra.mxu3 %vm200_vm1, %v3319_v52  ;;  %v828_v12 = vadd.f32 %v827_v6, %v4958_v10  ;;  %v4961_v52 = vld [vmem:[#allocation38_spill] sm:$0xff] }
 0x1c9   : > { %v1597_v30 = vpop.f32.mrf.mxu0  ;;  %v1070_v35 = vpop.f32.mrf.mxu2 }
 0x1ca   : > { %3222 = vmatmul.msk.f32.gmra.mxu1 %vm200_vm1, %v4950_v32  ;;  %v1120_v37 = vadd.f32 %v1070_v35, %v825_v53 }
 0x1cb   : > { %v1351_v63 = vpop.f32.mrf.mxu3 }
 0x1cc   : > { %3419 = vmatmul.msk.f32.gmra.mxu0 %vm200_vm1, %v4953_v50  ;;  %v1401_v39 = vadd.f32 %v1351_v63, %v1120_v37  ;;  %v3322_v37 = vld [vmem:[#allocation2 + $0xa9] sm:$0xff] }
 0x1ce   : > { %v4453_v38 = vadd.f32 %v1597_v30, %v1401_v39  ;;  %3288 = vmatmul.msk.f32.gmra.mxu2 %vm200_vm1, %v4957_v40  ;;  %v4962_v39 = vld [vmem:[#allocation53_spill] sm:$0xff] }
 0x1cf   : > { %v830_v56 = vpop.f32.mrf.mxu1 }
 0x1d0   : > { %3354 = vmatmul.msk.f32.gmra.mxu3 %vm200_vm1, %v3320_v43  ;;  %v831_v6 = vadd.f32 %v830_v56, %v4961_v52  ;;  %v4963_v43 = vld [vmem:[#allocation46_spill] sm:$0xff]  ;;  %v4964_v56 = vld [vmem:[#allocation41_spill] sm:$0xff] }
 0x1d1   : > { %v1600_v54 = vpop.f32.mrf.mxu0  ;;  %v1073_v36 = vpop.f32.mrf.mxu2 }
 0x1d2   : > { %3223 = vmatmul.msk.f32.gmra.mxu1 %vm200_vm1, %v4953_v50  ;;  %v1121_v32 = vadd.f32 %v1073_v36, %v828_v12 }
 0x1d3   : > { %v1354_v46 = vpop.f32.mrf.mxu3 }
 0x1d4   : > { %3420 = vmatmul.msk.f32.gmra.mxu0 %vm200_vm1, %v4956_v60  ;;  %v1402_v28 = vadd.f32 %v1354_v46, %v1121_v32  ;;  %v3323_v46 = vld [vmem:[#allocation2 + $0xb1] sm:$0xff] }
 0x1d6   : > { %v4463_v30 = vadd.f32 %v1600_v54, %v1402_v28  ;;  %3289 = vmatmul.msk.f32.gmra.mxu2 %vm200_vm1, %v4960_v31  ;;  %v4966_v31 = vld [vmem:[#allocation50_spill] sm:$0xff] }
 0x1d7   : > { %v833_v44 = vpop.f32.mrf.mxu1 }
 0x1d8   : > { %3355 = vmatmul.msk.f32.gmra.mxu3 %vm200_vm1, %v3321_v59  ;;  %v834_v40 = vadd.f32 %v833_v44, %v4964_v56  ;;  %v4965_v59 = vld [vmem:[#allocation57_spill] sm:$0xff]  ;;  %v4967_v44 = vld [vmem:[#allocation44_spill] sm:$0xff]  ;;  %v4969_v56 = vld [vmem:[#allocation54_spill] sm:$0xff] }
 0x1d9   : > { %v1603_v48 = vpop.f32.mrf.mxu0  ;;  %v1076_v50 = vpop.f32.mrf.mxu2 }
 0x1da   : > { %3224 = vmatmul.msk.f32.gmra.mxu1 %vm200_vm1, %v4956_v60  ;;  %v1122_v2 = vadd.f32 %v1076_v50, %v831_v6 }
 0x1db   : > { %v1357_v26 = vpop.f32.mrf.mxu3 }
 0x1dc   : > { %3421 = vmatmul.msk.f32.gmra.mxu0 %vm200_vm1, %v4959_v49  ;;  %v1403_v35 = vadd.f32 %v1357_v26, %v1122_v2 }
 0x1de   : > { %v4473_v54 = vadd.f32 %v1603_v48, %v1403_v35  ;;  %3290 = vmatmul.msk.f32.gmra.mxu2 %vm200_vm1, %v4963_v43  ;;  %v3324_v35 = vld [vmem:[#allocation2 + $0xc1] sm:$0xff]  ;;  %v4968_v43 = vld [vmem:[#allocation60_spill] sm:$0xff] }
 0x1df   : > { %v836_v63 = vpop.f32.mrf.mxu1 }
 0x1e0   : > { %3356 = vmatmul.msk.f32.gmra.mxu3 %vm200_vm1, %v3322_v37  ;;  %v837_v52 = vadd.f32 %v836_v63, %v4967_v44  ;;  %v4970_v63 = vld [vmem:[#allocation48_spill] sm:$0xff] }
 0x1e1   : > { %v1606_v53 = vpop.f32.mrf.mxu0  ;;  %v1079_v60 = vpop.f32.mrf.mxu2 }
 0x1e2   : > { %3225 = vmatmul.msk.f32.gmra.mxu1 %vm200_vm1, %v4959_v49  ;;  %v1123_v10 = vadd.f32 %v1079_v60, %v834_v40 }
 0x1e3   : > { %v1360_v12 = vpop.f32.mrf.mxu3 }
 0x1e4   : > { %3422 = vmatmul.msk.f32.gmra.mxu0 %vm200_vm1, %v4962_v39  ;;  %v1404_v32 = vadd.f32 %v1360_v12, %v1123_v10 }
 0x1e6   : > { %v4483_v48 = vadd.f32 %v1606_v53, %v1404_v32  ;;  %3291 = vmatmul.msk.f32.gmra.mxu2 %vm200_vm1, %v4966_v31 }
 0x1e7   : > { %v839_v28 = vpop.f32.mrf.mxu1 }
 0x1e8   : > { %3357 = vmatmul.msk.f32.gmra.mxu3 %vm200_vm1, %v3323_v46  ;;  %v840_v40 = vadd.f32 %v839_v28, %v4970_v63  ;;  %v3325_v46 = vld [vmem:[#allocation2 + $0xc9] sm:$0xff]  ;;  %v4971_v28 = vld [vmem:[#allocation52_spill] sm:$0xff] }
 0x1e9   : > { %v1609_v36 = vpop.f32.mrf.mxu0  ;;  %v1082_v49 = vpop.f32.mrf.mxu2 }
 0x1ea   : > { %3226 = vmatmul.msk.f32.gmra.mxu1 %vm200_vm1, %v4962_v39  ;;  %v1124_v6 = vadd.f32 %v1082_v49, %v837_v52 }
 0x1eb   : > { %v1363_v50 = vpop.f32.mrf.mxu3 }
 0x1ec   : > { %3423 = vmatmul.msk.f32.gmra.mxu0 %vm200_vm1, %v4965_v59  ;;  %v1405_v26 = vadd.f32 %v1363_v50, %v1124_v6 }
 0x1ee   : > { %v4493_v53 = vadd.f32 %v1609_v36, %v1405_v26  ;;  %3292 = vmatmul.msk.f32.gmra.mxu2 %vm200_vm1, %v4969_v56  ;;  %v3326_v26 = vld [vmem:[#allocation2 + $0xd9] sm:$0xff] }
 0x1ef   : > { %v842_v37 = vpop.f32.mrf.mxu1 }
 0x1f0   : > { %3358 = vmatmul.msk.f32.gmra.mxu3 %vm200_vm1, %v3324_v35  ;;  %v843_v44 = vadd.f32 %v842_v37, %v4971_v28 }
 0x1f1   : > { %v1612_v2 = vpop.f32.mrf.mxu0  ;;  %v1085_v39 = vpop.f32.mrf.mxu2 }
 0x1f2   : > { %3227 = vmatmul.msk.f32.gmra.mxu1 %vm200_vm1, %v4965_v59  ;;  %v1125_v60 = vadd.f32 %v1085_v39, %v840_v40 }
 0x1f3   : > { %v1366_v10 = vpop.f32.mrf.mxu3 }
 0x1f4   : > { %3424 = vmatmul.msk.f32.gmra.mxu0 %vm200_vm1, %v4968_v43  ;;  %v1406_v32 = vadd.f32 %v1366_v10, %v1125_v60  ;;  %v3327_v60 = vld [vmem:[#allocation2 + $0xe1] sm:$0xff] }
 0x1f6   : > { %v4503_v36 = vadd.f32 %v1612_v2, %v1406_v32  ;;  %3293 = vmatmul.msk.f32.gmra.mxu2 %vm200_vm1, %v4119_v62  ;;  %v4972_v62 = vld [vmem:[#allocation56_spill] sm:$0xff] }
 0x1f7   : > { %v845_v31 = vpop.f32.mrf.mxu1 }
 0x1f8   : > { %3359 = vmatmul.msk.f32.gmra.mxu3 %vm200_vm1, %v3325_v46  ;;  %v846_v37 = vadd.f32 %v845_v31, %v4972_v62 }
 0x1f9   : > { %v1615_v12 = vpop.f32.mrf.mxu0  ;;  %v1088_v59 = vpop.f32.mrf.mxu2 }
 0x1fa   : > { %3228 = vmatmul.msk.f32.gmra.mxu1 %vm200_vm1, %v4968_v43  ;;  %v1126_v52 = vadd.f32 %v1088_v59, %v843_v44  ;;  %v3328_v59 = vld [vmem:[#allocation2 + $0xf1] sm:$0xff] }
 0x1fb   : > { %v1369_v49 = vpop.f32.mrf.mxu3 }
 0x1fc   : > { %3425 = vmatmul.msk.f32.gmra.mxu0 %vm200_vm1, %v4146_v57  ;;  %v1407_v50 = vadd.f32 %v1369_v49, %v1126_v52 }
 0x1fe   : > { %v4513_v2 = vadd.f32 %v1615_v12, %v1407_v50  ;;  %3294 = vmatmul.msk.f32.gmra.mxu2 %vm200_vm1, %v4135_v14  ;;  %v4973_v14 = vld [vmem:[#allocation59_spill] sm:$0xff] }
 0x1ff   : > { %v848_v35 = vpop.f32.mrf.mxu1 }
 0x200   : > { %3360 = vmatmul.msk.f32.gmra.mxu3 %vm200_vm1, %v3326_v26  ;;  %v849_v32 = vadd.f32 %v848_v35, %v4973_v14 }
 0x201   : > { %v1618_v6 = vpop.f32.mrf.mxu0  ;;  %v1091_v43 = vpop.f32.mrf.mxu2 }
 0x202   : > { %3229 = vmatmul.msk.f32.gmra.mxu1 %vm200_vm1, %v4146_v57  ;;  %v1127_v56 = vadd.f32 %v1091_v43, %v846_v37  ;;  %v4544_v37 = vld [vmem:[%s4810_s2] ss:$0 sm:$0xff] }
 0x203   : > { %v1372_v63 = vpop.f32.mrf.mxu3  ;;  %v3329_v43 = vld [vmem:[#allocation2 + $0xf9] sm:$0xff] }
 0x204   : > { %3426 = vmatmul.msk.f32.gmra.mxu0 %vm200_vm1, %v4161_v5  ;;  %v1408_v39 = vadd.f32 %v1372_v63, %v1127_v56 }
 0x206   : > { %v4523_v12 = vadd.f32 %v1618_v6, %v1408_v39  ;;  %3295 = vmatmul.msk.f32.gmra.mxu2 %vm200_vm1, %v4148_v23  ;;  %v4974_v23 = vld [vmem:[#allocation61_spill] sm:$0xff] }
 0x207   : > { %v1806_v10 = vpop.f32.mrf.mxu1 }
 0x208   : > { %3361 = vmatmul.msk.f32.gmra.mxu3 %vm200_vm1, %v3327_v60  ;;  %v1902_v6 = vadd.f32 %v1806_v10, %v4974_v23  ;;  %v4976_v60 = vld [vmem:[#allocation14_spill] sm:$0xff] }
 0x209   : > { %v1621_v40 = vpop.f32.mrf.mxu0  ;;  %v1094_v57 = vpop.f32.mrf.mxu2  ;;  %v4978_v23 = vld [vmem:[#allocation18_spill] sm:$0xff] }
 0x20a   : > { %3230 = vmatmul.msk.f32.gmra.mxu1 %vm200_vm1, %v4161_v5  ;;  %v1128_v46 = vadd.f32 %v1094_v57, %v849_v32 }
 0x20b   : > { %v1375_v31 = vpop.f32.mrf.mxu3 }
 0x20c   : > { %3427 = vmatmul.msk.f32.gmra.mxu0 %vm200_vm1, %v4176_v58  ;;  %v1409_v44 = vadd.f32 %v1375_v31, %v1128_v46  ;;  %v3330_v46 = vld [vmem:[#allocation2 + $0x109] sm:$0xff] }
 0x20e   : > { %v4533_v49 = vadd.f32 %v1621_v40, %v1409_v44  ;;  %3296 = vmatmul.msk.f32.gmra.mxu2 %vm200_vm1, %v4163_v34 }
 0x20f   : > { %v1809_v52 = vpop.f32.mrf.mxu1 }
 0x210   : > { %3362 = vmatmul.msk.f32.gmra.mxu3 %vm200_vm1, %v3328_v59 }
 0x211   : > { %v2643_v28 = vpop.f32.mrf.mxu0  ;;  %v2087_v5 = vpop.f32.mrf.mxu2 }
 0x212   : > { %3231 = vmatmul.msk.f32.gmra.mxu1 %vm200_vm1, %v4176_v58  ;;  %v2183_v50 = vadd.f32 %v2087_v5, %v1902_v6  ;;  %v4975_v58 = vld [vmem:[#allocation62_spill] sm:$0xff] }
 0x213   : > { %v2365_v26 = vpop.f32.mrf.mxu3  ;;  %v1903_v63 = vadd.f32 %v1809_v52, %v4975_v58 }
 0x214   : > { %3428 = vmatmul.msk.f32.gmra.mxu0 %vm200_vm1, %v4191_v11  ;;  %v2461_v62 = vadd.f32 %v2365_v26, %v2183_v50 }
 0x216   : > { %v2739_v56 = vadd.f32 %v2643_v28, %v2461_v62  ;;  %3297 = vmatmul.msk.f32.gmra.mxu2 %vm200_vm1, %v4178_v22  ;;  %v4977_v28 = vld [vmem:[#allocation63_spill] sm:$0xff] }
 0x217   : > { %v1812_v34 = vpop.f32.mrf.mxu1 }
 0x218   : > { %3363 = vmatmul.msk.f32.gmra.mxu3 %vm200_vm1, %v3329_v43  ;;  %v2775_v40 = vadd.f32 %v4544_v37, %v2739_v56  ;;  %v1904_v44 = vadd.f32 %v1812_v34, %v4977_v28 }
 0x219   : > { %v2646_v35 = vpop.f32.mrf.mxu0  ;;  %v2090_v39 = vpop.f32.mrf.mxu2 }
 0x21a   : > { %3232 = vmatmul.msk.f32.gmra.mxu1 %vm200_vm1, %v4191_v11  ;;  %v2807_v10 = vadd.f32 %v2775_v40, %v4976_v60  ;;  %v2184_v22 = vadd.f32 %v2090_v39, %v1903_v63  ;;  %v4980_v63 = vld [vmem:[#allocation22_spill] sm:$0xff] }
 0x21b   : > { %v2368_v14 = vpop.f32.mrf.mxu3 }
 0x21c   : > { %3429 = vmatmul.msk.f32.gmra.mxu0 %vm200_vm1, %v4206_v3  ;;  %2839 = vst.msk [vmem:[%s4560_s20] sm:$0xff] %vm200_vm1, %v2807_v10  ;;  %v2462_v57 = vadd.f32 %v2368_v14, %v2184_v22 }
 0x21e   : > { %v2740_v11 = vadd.f32 %v2646_v35, %v2462_v57  ;;  %3298 = vmatmul.msk.f32.gmra.mxu2 %vm200_vm1, %v4193_v27  ;;  %v3331_v27 = vld [vmem:[#allocation2 + $0x111] sm:$0xff] }
 0x21f   : > { %v1815_v31 = vpop.f32.mrf.mxu1 }
 0x220   : > { %3364 = vmatmul.msk.f32.gmra.mxu3 %vm200_vm1, %v3330_v46  ;;  %v2776_v59 = vadd.f32 %v4544_v37, %v2740_v11  ;;  %v4982_v11 = vld [vmem:[#allocation26_spill] sm:$0xff] }
 0x221   : > { %v2649_v32 = vpop.f32.mrf.mxu0  ;;  %v2093_v52 = vpop.f32.mrf.mxu2 }
 0x222   : > { %3233 = vmatmul.msk.f32.gmra.mxu1 %vm200_vm1, %v4206_v3  ;;  %v2808_v6 = vadd.f32 %v2776_v59, %v4978_v23  ;;  %v2185_v5 = vadd.f32 %v2093_v52, %v1904_v44  ;;  %v4979_v3 = vld [vmem:[#allocation64_spill] sm:$0xff] }
 0x223   : > { %v2371_v50 = vpop.f32.mrf.mxu3  ;;  %v1905_v34 = vadd.f32 %v1815_v31, %v4979_v3 }
 0x224   : > { %3430 = vmatmul.msk.f32.gmra.mxu0 %vm200_vm1, %v4221_v13  ;;  %2840 = vst.msk [vmem:[%s4560_s20 + $0x8] sm:$0xff] %vm200_vm1, %v2808_v6  ;;  %v2463_v35 = vadd.f32 %v2371_v50, %v2185_v5 }
 0x226   : > { %v2741_v43 = vadd.f32 %v2649_v32, %v2463_v35  ;;  %3299 = vmatmul.msk.f32.gmra.mxu2 %vm200_vm1, %v4208_v33  ;;  %v3332_v33 = vld [vmem:[#allocation2 + $0x121] sm:$0xff] }
 0x227   : > { %v1818_v62 = vpop.f32.mrf.mxu1 }
 0x228   : > { %3365 = vmatmul.msk.f32.gmra.mxu3 %vm200_vm1, %v3331_v27  ;;  %v2777_v56 = vadd.f32 %v4544_v37, %v2741_v43  ;;  %v4984_v27 = vld [vmem:[#allocation30_spill] sm:$0xff] }
 0x229   : > { %v2652_v26 = vpop.f32.mrf.mxu0  ;;  %v2096_v58 = vpop.f32.mrf.mxu2 }
 0x22a   : > { %3234 = vmatmul.msk.f32.gmra.mxu1 %vm200_vm1, %v4221_v13  ;;  %v2809_v40 = vadd.f32 %v2777_v56, %v4980_v63  ;;  %v2186_v39 = vadd.f32 %v2096_v58, %v1905_v34  ;;  %v4981_v13 = vld [vmem:[#allocation65_spill] sm:$0xff] }
 0x22b   : > { %v2374_v60 = vpop.f32.mrf.mxu3  ;;  %v1906_v57 = vadd.f32 %v1818_v62, %v4981_v13 }
 0x22c   : > { %3431 = vmatmul.msk.f32.gmra.mxu0 %vm200_vm1, %v4236_v4  ;;  %2841 = vst.msk [vmem:[%s4560_s20 + $0x10] sm:$0xff] %vm200_vm1, %v2809_v40  ;;  %v2464_v22 = vadd.f32 %v2374_v60, %v2186_v39  ;;  %v4985_v40 = vld [vmem:[#allocation68_spill] sm:$0xff] }
 0x22e   : > { %v2742_v32 = vadd.f32 %v2652_v26, %v2464_v22  ;;  %3300 = vmatmul.msk.f32.gmra.mxu2 %vm200_vm1, %v4223_v41  ;;  %v3333_v41 = vld [vmem:[#allocation2 + $0x129] sm:$0xff]  ;;  %v4987_v22 = vld [vmem:[#allocation32_spill] sm:$0xff] }
 0x22f   : > { %v1821_v14 = vpop.f32.mrf.mxu1 }
 0x230   : > { %3366 = vmatmul.msk.f32.gmra.mxu3 %vm200_vm1, %v3332_v33  ;;  %v2778_v46 = vadd.f32 %v4544_v37, %v2742_v32 }
 0x231   : > { %v2655_v10 = vpop.f32.mrf.mxu0  ;;  %v2099_v31 = vpop.f32.mrf.mxu2 }
 0x232   : > { %3235 = vmatmul.msk.f32.gmra.mxu1 %vm200_vm1, %v4236_v4  ;;  %v2810_v28 = vadd.f32 %v2778_v46, %v4982_v11  ;;  %v2187_v44 = vadd.f32 %v2099_v31, %v1906_v57  ;;  %v4983_v4 = vld [vmem:[#allocation66_spill] sm:$0xff] }
 0x233   : > { %v2377_v59 = vpop.f32.mrf.mxu3  ;;  %v1907_v50 = vadd.f32 %v1821_v14, %v4983_v4  ;;  %v3335_v46 = vld [vmem:[#allocation2 + $0x141] sm:$0xff] }
 0x234   : > { %3432 = vmatmul.msk.f32.gmra.mxu0 %vm200_vm1, %v4251_v29  ;;  %2842 = vst.msk [vmem:[%s4560_s20 + $0x18] sm:$0xff] %vm200_vm1, %v2810_v28  ;;  %v2465_v23 = vadd.f32 %v2377_v59, %v2187_v44  ;;  %v4988_v28 = vld [vmem:[#allocation70_spill] sm:$0xff] }
 0x236   : > { %v2743_v5 = vadd.f32 %v2655_v10, %v2465_v23  ;;  %3301 = vmatmul.msk.f32.gmra.mxu2 %vm200_vm1, %v4238_v45  ;;  %v3334_v45 = vld [vmem:[#allocation2 + $0x139] sm:$0xff]  ;;  %v4990_v23 = vld [vmem:[#allocation3_spill] sm:$0xff] }
 0x237   : > { %v1824_v6 = vpop.f32.mrf.mxu1 }
 0x238   : > { %3367 = vmatmul.msk.f32.gmra.mxu3 %vm200_vm1, %v3333_v41  ;;  %v2779_v26 = vadd.f32 %v4544_v37, %v2743_v5 }
 0x239   : > { %v2658_v52 = vpop.f32.mrf.mxu0  ;;  %v2102_v35 = vpop.f32.mrf.mxu2 }
 0x23a   : > { %3236 = vmatmul.msk.f32.gmra.mxu1 %vm200_vm1, %v4251_v29  ;;  %v2811_v62 = vadd.f32 %v2779_v26, %v4984_v27  ;;  %v2188_v43 = vadd.f32 %v2102_v35, %v1907_v50  ;;  %v4986_v29 = vld [vmem:[#allocation67_spill] sm:$0xff] }
 0x23b   : > { %v2380_v3 = vpop.f32.mrf.mxu3  ;;  %v1908_v39 = vadd.f32 %v1824_v6, %v4986_v29  ;;  %v3336_v26 = vld [vmem:[#allocation2 + $0x151] sm:$0xff]  ;;  %v3337_v29 = vld [vmem:[#allocation2 + $0x159] sm:$0xff] }
 0x23c   : > { %3433 = vmatmul.msk.f32.gmra.mxu0 %vm200_vm1, %v4266_v0  ;;  %2843 = vst.msk [vmem:[%s4560_s20 + $0x20] sm:$0xff] %vm200_vm1, %v2811_v62  ;;  %v2466_v56 = vadd.f32 %v2380_v3, %v2188_v43  ;;  %v4991_v62 = vld [vmem:[#allocation73_spill] sm:$0xff] }
 0x23e   : > { %v2744_v63 = vadd.f32 %v2658_v52, %v2466_v56  ;;  %3302 = vmatmul.msk.f32.gmra.mxu2 %vm200_vm1, %v4985_v40  ;;  %v4993_v56 = vld [vmem:[#allocation6_spill] sm:$0xff] }
 0x23f   : > { %v1827_v58 = vpop.f32.mrf.mxu1 }
 0x240   : > { %3368 = vmatmul.msk.f32.gmra.mxu3 %vm200_vm1, %v3334_v45  ;;  %v2780_v60 = vadd.f32 %v4544_v37, %v2744_v63 }
 0x241   : > { %v2661_v34 = vpop.f32.mrf.mxu0  ;;  %v2105_v10 = vpop.f32.mrf.mxu2 }
 0x242   : > { %3237 = vmatmul.msk.f32.gmra.mxu1 %vm200_vm1, %v4266_v0  ;;  %v2812_v33 = vadd.f32 %v2780_v60, %v4987_v22  ;;  %v2189_v14 = vadd.f32 %v2105_v10, %v1908_v39  ;;  %v4989_v0 = vld [vmem:[#allocation69_spill] sm:$0xff]  ;;  %v3206_v60 = vld [vmem:[#allocation2 + $0x152] sm:$0xff] }
 0x243   : > { %v2383_v32 = vpop.f32.mrf.mxu3  ;;  %v1909_v44 = vadd.f32 %v1827_v58, %v4989_v0  ;;  %v4994_v22 = vld [vmem:[#allocation75_spill] sm:$0xff] }
 0x244   : > { %3434 = vmatmul.msk.f32.gmra.mxu0 %vm200_vm1, %v4286_v16  ;;  %2844 = vst.msk [vmem:[%s4560_s20 + $0x28] sm:$0xff] %vm200_vm1, %v2812_v33  ;;  %v2467_v57 = vadd.f32 %v2383_v32, %v2189_v14  ;;  %v3338_v0 = vld [vmem:[#allocation2 + $0x169] sm:$0xff] }
 0x246   : > { %v2745_v11 = vadd.f32 %v2661_v34, %v2467_v57  ;;  %3303 = vmatmul.msk.f32.gmra.mxu2 %vm200_vm1, %v4988_v28  ;;  %v3272_v28 = vld [vmem:[#allocation2 + $0x168] sm:$0xff] }
 0x247   : > { %v1830_v31 = vpop.f32.mrf.mxu1 }
 0x248   : > { %3369 = vmatmul.msk.f32.gmra.mxu3 %vm200_vm1, %v3335_v46  ;;  %v2781_v59 = vadd.f32 %v4544_v37, %v2745_v11 }
 0x249   : > { %v2664_v13 = vpop.f32.mrf.mxu0  ;;  %v2108_v52 = vpop.f32.mrf.mxu2 }
 0x24a   : > { %3238 = vmatmul.msk.f32.gmra.mxu1 %vm200_vm1, %v4286_v16  ;;  %v2813_v41 = vadd.f32 %v2781_v59, %v4990_v23  ;;  %v2190_v6 = vadd.f32 %v2108_v52, %v1909_v44  ;;  %v4992_v16 = vld [vmem:[#allocation71_spill] sm:$0xff]  ;;  %v3207_v59 = vld [vmem:[#allocation2 + $0x15a] sm:$0xff] }
 0x24b   : > { %v2386_v5 = vpop.f32.mrf.mxu3  ;;  %v1910_v43 = vadd.f32 %v1830_v31, %v4992_v16  ;;  %v4997_v23 = vld [vmem:[#allocation76_spill] sm:$0xff] }
 0x24c   : > { %3435 = vmatmul.msk.f32.gmra.mxu0 %vm200_vm1, %v4306_v17  ;;  %2845 = vst.msk [vmem:[%s4560_s20 + $0x30] sm:$0xff] %vm200_vm1, %v2813_v41  ;;  %v2468_v50 = vadd.f32 %v2386_v5, %v2190_v6  ;;  %v3339_v16 = vld [vmem:[#allocation2 + $0x171] sm:$0xff] }
 0x24e   : > { %v2746_v27 = vadd.f32 %v2664_v13, %v2468_v50  ;;  %3304 = vmatmul.msk.f32.gmra.mxu2 %vm200_vm1, %v4991_v62  ;;  %v4996_v13 = vld [vmem:[#allocation9_spill] sm:$0xff]  ;;  %v3273_v62 = vld [vmem:[#allocation2 + $0x170] sm:$0xff] }
 0x24f   : > { %v1833_v35 = vpop.f32.mrf.mxu1 }
 0x250   : > { %3370 = vmatmul.msk.f32.gmra.mxu3 %vm200_vm1, %v3336_v26  ;;  %v2782_v3 = vadd.f32 %v4544_v37, %v2746_v27 }
 0x251   : > { %v2667_v4 = vpop.f32.mrf.mxu0  ;;  %v2111_v34 = vpop.f32.mrf.mxu2 }
 0x252   : > { %3239 = vmatmul.msk.f32.gmra.mxu1 %vm200_vm1, %v4306_v17  ;;  %v2814_v45 = vadd.f32 %v2782_v3, %v4993_v56  ;;  %v2191_v58 = vadd.f32 %v2111_v34, %v1910_v43  ;;  %v4995_v17 = vld [vmem:[#allocation74_spill] sm:$0xff]  ;;  %v4999_v56 = vld [vmem:[#allocation77_spill] sm:$0xff] }
 0x253   : > { %v2389_v63 = vpop.f32.mrf.mxu3  ;;  %v1911_v33 = vadd.f32 %v1833_v35, %v4995_v17  ;;  %v3208_v3 = vld [vmem:[#allocation2 + $0x16a] sm:$0xff]  ;;  %v3340_v17 = vld [vmem:[#allocation2 + $0x181] sm:$0xff] }
 0x254   : > { %3436 = vmatmul.msk.f32.gmra.mxu0 %vm200_vm1, %v4321_v18  ;;  %2846 = vst.msk [vmem:[%s4560_s20 + $0x38] sm:$0xff] %vm200_vm1, %v2814_v45  ;;  %v2469_v18 = vadd.f32 %v2389_v63, %v2191_v58 }
 0x256   : > { %v2747_v10 = vadd.f32 %v2667_v4, %v2469_v18  ;;  %3305 = vmatmul.msk.f32.gmra.mxu2 %vm200_vm1, %v4994_v22  ;;  %v4998_v4 = vld [vmem:[#allocation12_spill] sm:$0xff]  ;;  %v3274_v22 = vld [vmem:[#allocation2 + $0x180] sm:$0xff] }
 0x257   : > { %v1836_v39 = vpop.f32.mrf.mxu1 }
 0x258   : > { %3371 = vmatmul.msk.f32.gmra.mxu3 %vm200_vm1, %v3337_v29  ;;  %v2783_v14 = vadd.f32 %v4544_v37, %v2747_v10  ;;  %v1912_v41 = vadd.f32 %v1836_v39, %v4997_v23  ;;  %v3406_v10 = vld [vmem:[#allocation2 + $0x182] sm:$0xff] }
 0x259   : > { %v2670_v40 = vpop.f32.mrf.mxu0  ;;  %v2114_v32 = vpop.f32.mrf.mxu2  ;;  %v3341_v23 = vld [vmem:[#allocation2 + $0x189] sm:$0xff] }
 0x25a   : > { %3240 = vmatmul.msk.f32.gmra.mxu1 %vm200_vm1, %v3206_v60  ;;  %v2815_v57 = vadd.f32 %v2783_v14, %v4996_v13  ;;  %v2192_v46 = vadd.f32 %v2114_v32, %v1911_v33  ;;  %v3209_v14 = vld [vmem:[#allocation2 + $0x172] sm:$0xff] }
 0x25b   : > { %v2392_v31 = vpop.f32.mrf.mxu3 }
 0x25c   : > { %3437 = vmatmul.msk.f32.gmra.mxu0 %vm200_vm1, %v4333_v42  ;;  %2847 = vst.msk [vmem:[%s4560_s20 + $0x40] sm:$0xff] %vm200_vm1, %v2815_v57  ;;  %v2470_v42 = vadd.f32 %v2392_v31, %v2192_v46  ;;  %v5001_v31 = vld [vmem:[#allocation20_spill] sm:$0xff] }
 0x25e   : > { %v2748_v52 = vadd.f32 %v2670_v40, %v2470_v42  ;;  %3306 = vmatmul.msk.f32.gmra.mxu2 %vm200_vm1, %v3272_v28  ;;  %v5000_v40 = vld [vmem:[#allocation16_spill] sm:$0xff] }
 0x25f   : > { %v1839_v44 = vpop.f32.mrf.mxu1 }
 0x260   : > { %3372 = vmatmul.msk.f32.gmra.mxu3 %vm200_vm1, %v3338_v0  ;;  %v2784_v6 = vadd.f32 %v4544_v37, %v2748_v52  ;;  %v1913_v45 = vadd.f32 %v1839_v44, %v4999_v56  ;;  %v3407_v44 = vld [vmem:[#allocation2 + $0x18a] sm:$0xff] }
 0x261   : > { %v2673_v11 = vpop.f32.mrf.mxu0  ;;  %v2117_v5 = vpop.f32.mrf.mxu2 }
 0x262   : > { %3241 = vmatmul.msk.f32.gmra.mxu1 %vm200_vm1, %v3207_v59  ;;  %v2816_v50 = vadd.f32 %v2784_v6, %v4998_v4  ;;  %v2193_v26 = vadd.f32 %v2117_v5, %v1912_v41  ;;  %v3275_v59 = vld [vmem:[#allocation2 + $0x188] sm:$0xff] }
 0x263   : > { %v2395_v35 = vpop.f32.mrf.mxu3 }
 0x264   : > { %3438 = vmatmul.msk.f32.gmra.mxu0 %vm200_vm1, %v4344_v47  ;;  %2848 = vst.msk [vmem:[%s4560_s20 + $0x48] sm:$0xff] %vm200_vm1, %v2816_v50  ;;  %v2471_v47 = vadd.f32 %v2395_v35, %v2193_v26  ;;  %v5002_v50 = vld [vmem:[#allocation24_spill] sm:$0xff] }
 0x266   : > { %v2749_v34 = vadd.f32 %v2673_v11, %v2471_v47  ;;  %3307 = vmatmul.msk.f32.gmra.mxu2 %vm200_vm1, %v3273_v62  ;;  %v3408_v47 = vld [vmem:[#allocation2 + $0x19a] sm:$0xff] }
 0x267   : > { %v1842_v43 = vpop.f32.mrf.mxu1 }
 0x268   : > { %3373 = vmatmul.msk.f32.gmra.mxu3 %vm200_vm1, %v3339_v16  ;;  %v2785_v58 = vadd.f32 %v4544_v37, %v2749_v34  ;;  %v1914_v13 = vadd.f32 %v1842_v43, %v4337_v7  ;;  %v3276_v16 = vld [vmem:[#allocation2 + $0x198] sm:$0xff] }
 0x269   : > { %v2676_v27 = vpop.f32.mrf.mxu0  ;;  %v2120_v63 = vpop.f32.mrf.mxu2 }
 0x26a   : > { %3242 = vmatmul.msk.f32.gmra.mxu1 %vm200_vm1, %v3208_v3  ;;  %v2817_v18 = vadd.f32 %v2785_v58, %v5000_v40  ;;  %v2194_v29 = vadd.f32 %v2120_v63, %v1913_v45  ;;  %v3342_v3 = vld [vmem:[#allocation2 + $0x199] sm:$0xff] }
 0x26b   : > { %v2398_v39 = vpop.f32.mrf.mxu3  ;;  %v5003_v63 = vld [vmem:[#allocation28_spill] sm:$0xff] }
 0x26c   : > { %3439 = vmatmul.msk.f32.gmra.mxu0 %vm200_vm1, %v4355_v9  ;;  %2849 = vst.msk [vmem:[%s4560_s20 + $0x50] sm:$0xff] %vm200_vm1, %v2817_v18  ;;  %v2472_v9 = vadd.f32 %v2398_v39, %v2194_v29 }
 0x26e   : > { %v2750_v32 = vadd.f32 %v2676_v27, %v2472_v9  ;;  %3308 = vmatmul.msk.f32.gmra.mxu2 %vm200_vm1, %v3274_v22  ;;  %v3343_v9 = vld [vmem:[#allocation2 + $0x1a1] sm:$0xff] }
 0x26f   : > { %v1845_v33 = vpop.f32.mrf.mxu1 }
 0x270   : > { %3374 = vmatmul.msk.f32.gmra.mxu3 %vm200_vm1, %v3340_v17  ;;  %v2786_v57 = vadd.f32 %v4544_v37, %v2750_v32  ;;  %v1915_v6 = vadd.f32 %v1845_v33, %v4348_v24 }
 0x271   : > { %v2679_v60 = vpop.f32.mrf.mxu0  ;;  %v2123_v46 = vpop.f32.mrf.mxu2 }
 0x272   : > { %3243 = vmatmul.msk.f32.gmra.mxu1 %vm200_vm1, %v3209_v14  ;;  %v2818_v11 = vadd.f32 %v2786_v57, %v5001_v31  ;;  %v2195_v28 = vadd.f32 %v2123_v46, %v1914_v13  ;;  %v5004_v13 = vld [vmem:[#allocation4_spill] sm:$0xff] }
 0x273   : > { %v2401_v42 = vpop.f32.mrf.mxu3 }
 0x274   : > { %3440 = vmatmul.msk.f32.gmra.mxu0 %vm200_vm1, %v3406_v10  ;;  %2850 = vst.msk [vmem:[%s4560_s20 + $0x58] sm:$0xff] %vm200_vm1, %v2818_v11  ;;  %v2473_v52 = vadd.f32 %v2401_v42, %v2195_v28 }
 0x276   : > { %v2751_v7 = vadd.f32 %v2679_v60, %v2473_v52  ;;  %3309 = vmatmul.msk.f32.gmra.mxu2 %vm200_vm1, %v3275_v59  ;;  %v3409_v60 = vld [vmem:[#allocation2 + $0x1a2] sm:$0xff] }
 0x277   : > { %v1848_v41 = vpop.f32.mrf.mxu1 }
 0x278   : > { %3375 = vmatmul.msk.f32.gmra.mxu3 %vm200_vm1, %v3341_v23  ;;  %v2787_v5 = vadd.f32 %v4544_v37, %v2751_v7  ;;  %v1916_v56 = vadd.f32 %v1848_v41, %v4359_v20 }
 0x279   : > { %v2682_v0 = vpop.f32.mrf.mxu0  ;;  %v2126_v4 = vpop.f32.mrf.mxu2 }
 0x27a   : > { %3244 = vmatmul.msk.f32.gmra.mxu1 %vm200_vm1, %v3406_v10  ;;  %v2819_v26 = vadd.f32 %v2787_v5, %v5002_v50  ;;  %v2196_v35 = vadd.f32 %v2126_v4, %v1915_v6  ;;  %v3277_v10 = vld [vmem:[#allocation2 + $0x1a0] sm:$0xff] }
 0x27b   : > { %v2404_v27 = vpop.f32.mrf.mxu3 }
 0x27c   : > { %3441 = vmatmul.msk.f32.gmra.mxu0 %vm200_vm1, %v3407_v44  ;;  %2851 = vst.msk [vmem:[%s4560_s20 + $0x60] sm:$0xff] %vm200_vm1, %v2819_v26  ;;  %v2474_v43 = vadd.f32 %v2404_v27, %v2196_v35 }
 0x27e   : > { %v2752_v24 = vadd.f32 %v2682_v0, %v2474_v43  ;;  %3310 = vmatmul.msk.f32.gmra.mxu2 %vm200_vm1, %v3276_v16 }
 0x27f   : > { %v1851_v34 = vpop.f32.mrf.mxu1 }
 0x280   : > { %3376 = vmatmul.msk.f32.gmra.mxu3 %vm200_vm1, %v3342_v3  ;;  %v2788_v45 = vadd.f32 %v4544_v37, %v2752_v24  ;;  %v1917_v33 = vadd.f32 %v1851_v34, %v4369_v8  ;;  %v5005_v8 = vld [vmem:[#allocation7_spill] sm:$0xff] }
 0x281   : > { %v2685_v62 = vpop.f32.mrf.mxu0  ;;  %v2129_v58 = vpop.f32.mrf.mxu2 }
 0x282   : > { %3245 = vmatmul.msk.f32.gmra.mxu1 %vm200_vm1, %v3407_v44  ;;  %v2820_v40 = vadd.f32 %v2788_v45, %v5003_v63  ;;  %v2197_v18 = vadd.f32 %v2129_v58, %v1916_v56 }
 0x283   : > { %v2407_v29 = vpop.f32.mrf.mxu3 }
 0x284   : > { %3442 = vmatmul.msk.f32.gmra.mxu0 %vm200_vm1, %v3408_v47  ;;  %2852 = vst.msk [vmem:[%s4560_s20 + $0x68] sm:$0xff] %vm200_vm1, %v2820_v40  ;;  %v2475_v22 = vadd.f32 %v2407_v29, %v2197_v18 }
 0x286   : > { %v2753_v20 = vadd.f32 %v2685_v62, %v2475_v22  ;;  %3311 = vmatmul.msk.f32.gmra.mxu2 %vm200_vm1, %v3277_v10 }
 0x287   : > { %v1854_v17 = vpop.f32.mrf.mxu1 }
 0x288   : > { %3377 = vmatmul.msk.f32.gmra.mxu3 %vm200_vm1, %v3343_v9  ;;  %v2789_v14 = vadd.f32 %v4544_v37, %v2753_v20  ;;  %v1918_v44 = vadd.f32 %v1854_v17, %v4380_v25  ;;  %v5006_v25 = vld [vmem:[#allocation10_spill] sm:$0xff] }
 0x289   : > { %v2688_v39 = vpop.f32.mrf.mxu0  ;;  %v2132_v32 = vpop.f32.mrf.mxu2 }
 0x28a   : > { %v2821_v57 = vadd.f32 %v2789_v14, %v5004_v13  ;;  %v2198_v46 = vadd.f32 %v2132_v32, %v1917_v33 }
 0x28b   : > { %v2410_v31 = vpop.f32.mrf.mxu3 }
 0x28c   : > { %3443 = vmatmul.msk.f32.gmra.mxu0 %vm200_vm1, %v3409_v60  ;;  %2853 = vst.msk [vmem:[%s4560_s20 + $0x70] sm:$0xff] %vm200_vm1, %v2821_v57  ;;  %v2476_v28 = vadd.f32 %v2410_v31, %v2198_v46 }
 0x28e   : > { %v2754_v0 = vadd.f32 %v2688_v39, %v2476_v28 }
 0x28f   : > { %v1857_v42 = vpop.f32.mrf.mxu1 }
 0x290   : > { %v2790_v59 = vadd.f32 %v4544_v37, %v2754_v0  ;;  %v1919_v26 = vadd.f32 %v1857_v42, %v4391_v61  ;;  %v5007_v61 = vld [vmem:[#allocation13_spill] sm:$0xff] }
 0x291   : > { %v2691_v11 = vpop.f32.mrf.mxu0  ;;  %v2135_v52 = vpop.f32.mrf.mxu2 }
 0x292   : > { %v2822_v23 = vadd.f32 %v2790_v59, %v5005_v8  ;;  %v2199_v41 = vadd.f32 %v2135_v52, %v1918_v44 }
 0x293   : > { %v2413_v7 = vpop.f32.mrf.mxu3 }
 0x294   : > { %2854 = vst.msk [vmem:[%s4560_s20 + $0x78] sm:$0xff] %vm200_vm1, %v2822_v23  ;;  %v2477_v5 = vadd.f32 %v2413_v7, %v2199_v41 }
 0x296   : > { %v2755_v50 = vadd.f32 %v2691_v11, %v2477_v5 }
 0x297   : > { %v1860_v4 = vpop.f32.mrf.mxu1 }
 0x298   : > { %v2791_v35 = vadd.f32 %v4544_v37, %v2755_v50  ;;  %v1920_v56 = vadd.f32 %v1860_v4, %v4402_v21  ;;  %v5008_v21 = vld [vmem:[#allocation17_spill] sm:$0xff] }
 0x299   : > { %v2694_v6 = vpop.f32.mrf.mxu0  ;;  %v2138_v27 = vpop.f32.mrf.mxu2 }
 0x29a   : > { %v2823_v62 = vadd.f32 %v2791_v35, %v5006_v25  ;;  %v2200_v47 = vadd.f32 %v2138_v27, %v1919_v26 }
 0x29b   : > { %v2416_v16 = vpop.f32.mrf.mxu3 }
 0x29c   : > { %2855 = vst.msk [vmem:[%s4560_s20 + $0x80] sm:$0xff] %vm200_vm1, %v2823_v62  ;;  %v2478_v3 = vadd.f32 %v2416_v16, %v2200_v47 }
 0x29e   : > { %v2756_v24 = vadd.f32 %v2694_v6, %v2478_v3 }
 0x29f   : > { %v1863_v34 = vpop.f32.mrf.mxu1 }
 0x2a0   : > { %v2792_v45 = vadd.f32 %v4544_v37, %v2756_v24  ;;  %v1921_v22 = vadd.f32 %v1863_v34, %v4413_v15  ;;  %v5009_v15 = vld [vmem:[#allocation21_spill] sm:$0xff] }
 0x2a1   : > { %v2697_v43 = vpop.f32.mrf.mxu0  ;;  %v2141_v58 = vpop.f32.mrf.mxu2 }
 0x2a2   : > { %v2824_v63 = vadd.f32 %v2792_v45, %v5007_v61  ;;  %v2201_v40 = vadd.f32 %v2141_v58, %v1920_v56 }
 0x2a3   : > { %v2419_v18 = vpop.f32.mrf.mxu3 }
 0x2a4   : > { %2856 = vst.msk [vmem:[%s4560_s20 + $0x88] sm:$0xff] %vm200_vm1, %v2824_v63  ;;  %v2479_v39 = vadd.f32 %v2419_v18, %v2201_v40 }
 0x2a6   : > { %v2757_v10 = vadd.f32 %v2697_v43, %v2479_v39 }
 0x2a7   : > { %v1866_v60 = vpop.f32.mrf.mxu1 }
 0x2a8   : > { %v2793_v9 = vadd.f32 %v4544_v37, %v2757_v10  ;;  %v1922_v31 = vadd.f32 %v1866_v60, %v4423_v55  ;;  %v5010_v55 = vld [vmem:[#allocation25_spill] sm:$0xff] }
 0x2a9   : > { %v2700_v29 = vpop.f32.mrf.mxu0  ;;  %v2144_v17 = vpop.f32.mrf.mxu2 }
 0x2aa   : > { %v2825_v20 = vadd.f32 %v2793_v9, %v5008_v21  ;;  %v2202_v33 = vadd.f32 %v2144_v17, %v1921_v22 }
 0x2ab   : > { %v2422_v14 = vpop.f32.mrf.mxu3 }
 0x2ac   : > { %2857 = vst.msk [vmem:[%s4560_s20 + $0x90] sm:$0xff] %vm200_vm1, %v2825_v20  ;;  %v2480_v13 = vadd.f32 %v2422_v14, %v2202_v33 }
 0x2ae   : > { %v2758_v46 = vadd.f32 %v2700_v29, %v2480_v13 }
 0x2af   : > { %v1869_v57 = vpop.f32.mrf.mxu1 }
 0x2b0   : > { %v2794_v11 = vadd.f32 %v4544_v37, %v2758_v46  ;;  %v1923_v41 = vadd.f32 %v1869_v57, %v4433_v1  ;;  %v5011_v1 = vld [vmem:[#allocation29_spill] sm:$0xff] }
 0x2b1   : > { %v2703_v32 = vpop.f32.mrf.mxu0  ;;  %v2147_v28 = vpop.f32.mrf.mxu2 }
 0x2b2   : > { %v2826_v42 = vadd.f32 %v2794_v11, %v5009_v15  ;;  %v2203_v0 = vadd.f32 %v2147_v28, %v1922_v31 }
 0x2b3   : > { %v2425_v44 = vpop.f32.mrf.mxu3 }
 0x2b4   : > { %2858 = vst.msk [vmem:[%s4560_s20 + $0x98] sm:$0xff] %vm200_vm1, %v2826_v42  ;;  %v2481_v52 = vadd.f32 %v2425_v44, %v2203_v0 }
 0x2b6   : > { %v2759_v23 = vadd.f32 %v2703_v32, %v2481_v52 }
 0x2b7   : > { %v1872_v8 = vpop.f32.mrf.mxu1 }
 0x2b8   : > { %v2795_v7 = vadd.f32 %v4544_v37, %v2759_v23  ;;  %v1924_v62 = vadd.f32 %v1872_v8, %v4443_v51  ;;  %v5012_v51 = vld [vmem:[#allocation5_spill] sm:$0xff] }
 0x2b9   : > { %v2706_v59 = vpop.f32.mrf.mxu0  ;;  %v2150_v6 = vpop.f32.mrf.mxu2 }
 0x2ba   : > { %v2827_v5 = vadd.f32 %v2795_v7, %v5010_v55  ;;  %v2204_v4 = vadd.f32 %v2150_v6, %v1923_v41  ;;  %v5015_v6 = vld [vmem:[#allocation15_spill] sm:$0xff] }
 0x2bb   : > { %v2428_v50 = vpop.f32.mrf.mxu3 }
 0x2bc   : > { %2859 = vst.msk [vmem:[%s4560_s20 + $0xa0] sm:$0xff] %vm200_vm1, %v2827_v5  ;;  %v2482_v35 = vadd.f32 %v2428_v50, %v2204_v4 }
 0x2be   : > { %v2760_v25 = vadd.f32 %v2706_v59, %v2482_v35 }
 0x2bf   : > { %v1875_v27 = vpop.f32.mrf.mxu1 }
 0x2c0   : > { %v2796_v47 = vadd.f32 %v4544_v37, %v2760_v25  ;;  %v1925_v61 = vadd.f32 %v1875_v27, %v4453_v38  ;;  %v5013_v38 = vld [vmem:[#allocation8_spill] sm:$0xff] }
 0x2c1   : > { %v2709_v26 = vpop.f32.mrf.mxu0  ;;  %v2153_v16 = vpop.f32.mrf.mxu2 }
 0x2c2   : > { %v2828_v43 = vadd.f32 %v2796_v47, %v5011_v1  ;;  %v2205_v3 = vadd.f32 %v2153_v16, %v1924_v62  ;;  %v5016_v47 = vld [vmem:[#allocation19_spill] sm:$0xff] }
 0x2c3   : > { %v2431_v34 = vpop.f32.mrf.mxu3 }
 0x2c4   : > { %2860 = vst.msk [vmem:[%s4560_s20 + $0xa8] sm:$0xff] %vm200_vm1, %v2828_v43  ;;  %v2483_v56 = vadd.f32 %v2431_v34, %v2205_v3 }
 0x2c6   : > { %v2761_v58 = vadd.f32 %v2709_v26, %v2483_v56 }
 0x2c7   : > { %v1878_v45 = vpop.f32.mrf.mxu1 }
 0x2c8   : > { %v2797_v63 = vadd.f32 %v4544_v37, %v2761_v58  ;;  %v1926_v17 = vadd.f32 %v1878_v45, %v4463_v30  ;;  %v5014_v30 = vld [vmem:[#allocation11_spill] sm:$0xff] }
 0x2c9   : > { %v2712_v24 = vpop.f32.mrf.mxu0  ;;  %v2156_v40 = vpop.f32.mrf.mxu2 }
 0x2ca   : > { %v2829_v18 = vadd.f32 %v2797_v63, %v5012_v51  ;;  %v2206_v29 = vadd.f32 %v2156_v40, %v1925_v61  ;;  %v5017_v61 = vld [vmem:[#allocation23_spill] sm:$0xff] }
 0x2cb   : > { %v2434_v39 = vpop.f32.mrf.mxu3 }
 0x2cc   : > { %2861 = vst.msk [vmem:[%s4560_s20 + $0xb0] sm:$0xff] %vm200_vm1, %v2829_v18  ;;  %v2484_v10 = vadd.f32 %v2434_v39, %v2206_v29 }
 0x2ce   : > { %v2762_v9 = vadd.f32 %v2712_v24, %v2484_v10 }
 0x2cf   : > { %v1881_v22 = vpop.f32.mrf.mxu1 }
 0x2d0   : > { %v2798_v21 = vadd.f32 %v4544_v37, %v2762_v9  ;;  %v1927_v11 = vadd.f32 %v1881_v22, %v4473_v54  ;;  %v5018_v22 = vld [vmem:[#allocation27_spill] sm:$0xff] }
 0x2d1   : > { %v2715_v60 = vpop.f32.mrf.mxu0  ;;  %v2159_v20 = vpop.f32.mrf.mxu2 }
 0x2d2   : > { %v2830_v33 = vadd.f32 %v2798_v21, %v5013_v38  ;;  %v2207_v14 = vadd.f32 %v2159_v20, %v1926_v17 }
 0x2d3   : > { %v2437_v32 = vpop.f32.mrf.mxu3 }
 0x2d4   : > { %2862 = vst.msk [vmem:[%s4560_s20 + $0xb8] sm:$0xff] %vm200_vm1, %v2830_v33  ;;  %v2485_v57 = vadd.f32 %v2437_v32, %v2207_v14 }
 0x2d6   : > { %v2763_v31 = vadd.f32 %v2715_v60, %v2485_v57  ;;  %v5019_v57 = vld [vmem:[#allocation31_spill] sm:$0xff] }
 0x2d7   : > { %v1884_v46 = vpop.f32.mrf.mxu1 }
 0x2d8   : > { %v2799_v28 = vadd.f32 %v4544_v37, %v2763_v31  ;;  %v1928_v41 = vadd.f32 %v1884_v46, %v4483_v48 }
 0x2d9   : > { %v2718_v13 = vpop.f32.mrf.mxu0  ;;  %v2162_v15 = vpop.f32.mrf.mxu2 }
 0x2da   : > { %v2831_v42 = vadd.f32 %v2799_v28, %v5014_v30  ;;  %v2208_v0 = vadd.f32 %v2162_v15, %v1927_v11 }
 0x2db   : > { %v2440_v44 = vpop.f32.mrf.mxu3 }
 0x2dc   : > { %2863 = vst.msk [vmem:[%s4560_s20 + $0xc0] sm:$0xff] %vm200_vm1, %v2831_v42  ;;  %v2486_v52 = vadd.f32 %v2440_v44, %v2208_v0  ;;  %v5020_v44 = vld [vmem:[#allocation72_spill] sm:$0xff] }
 0x2de   : > { %v2764_v23 = vadd.f32 %v2718_v13, %v2486_v52 }
 0x2df   : > { %v1887_v8 = vpop.f32.mrf.mxu1 }
 0x2e0   : > { %v2800_v7 = vadd.f32 %v4544_v37, %v2764_v23  ;;  %v1929_v25 = vadd.f32 %v1887_v8, %v4493_v53 }
 0x2e1   : > { %v2721_v59 = vpop.f32.mrf.mxu0  ;;  %v2165_v54 = vpop.f32.mrf.mxu2 }
 0x2e2   : > { %v2832_v55 = vadd.f32 %v2800_v7, %v5015_v6  ;;  %v2209_v5 = vadd.f32 %v2165_v54, %v1928_v41 }
 0x2e3   : > { %v2443_v4 = vpop.f32.mrf.mxu3 }
 0x2e4   : > { %2864 = vst.msk [vmem:[%s4560_s20 + $0xc8] sm:$0xff] %vm200_vm1, %v2832_v55  ;;  %v2487_v26 = vadd.f32 %v2443_v4, %v2209_v5 }
 0x2e6   : > { %v2765_v35 = vadd.f32 %v2721_v59, %v2487_v26 }
 0x2e7   : > { %v1890_v27 = vpop.f32.mrf.mxu1 }
 0x2e8   : > { %v2801_v62 = vadd.f32 %v4544_v37, %v2765_v35  ;;  %v1930_v56 = vadd.f32 %v1890_v27, %v4503_v36 }
 0x2e9   : > { %v2724_v50 = vpop.f32.mrf.mxu0  ;;  %v2168_v48 = vpop.f32.mrf.mxu2 }
 0x2ea   : > { %v2833_v16 = vadd.f32 %v2801_v62, %v5016_v47  ;;  %v2210_v1 = vadd.f32 %v2168_v48, %v1929_v25 }
 0x2eb   : > { %v2446_v43 = vpop.f32.mrf.mxu3 }
 0x2ec   : > { %2865 = vst.msk [vmem:[%s4560_s20 + $0xd0] sm:$0xff] %vm200_vm1, %v2833_v16  ;;  %v2488_v3 = vadd.f32 %v2446_v43, %v2210_v1 }
 0x2ee   : > { %v2766_v24 = vadd.f32 %v2724_v50, %v2488_v3 }
 0x2ef   : > { %v1893_v53 = vpop.f32.mrf.mxu1 }
 0x2f0   : > { %v2802_v45 = vadd.f32 %v4544_v37, %v2766_v24  ;;  %v1931_v60 = vadd.f32 %v1893_v53, %v4513_v2 }
 0x2f1   : > { %v2727_v34 = vpop.f32.mrf.mxu0  ;;  %v2171_v58 = vpop.f32.mrf.mxu2 }
 0x2f2   : > { %v2834_v63 = vadd.f32 %v2802_v45, %v5017_v61  ;;  %v2211_v40 = vadd.f32 %v2171_v58, %v1930_v56 }
 0x2f3   : > { %v2449_v51 = vpop.f32.mrf.mxu3 }
 0x2f4   : > { %2866 = vst.msk [vmem:[%s4560_s20 + $0xd8] sm:$0xff] %vm200_vm1, %v2834_v63  ;;  %v2489_v18 = vadd.f32 %v2449_v51, %v2211_v40 }
 0x2f6   : > { %v2767_v29 = vadd.f32 %v2727_v34, %v2489_v18 }
 0x2f7   : > { %v1896_v20 = vpop.f32.mrf.mxu1 }
 0x2f8   : > { %v2803_v10 = vadd.f32 %v4544_v37, %v2767_v29  ;;  %v1932_v14 = vadd.f32 %v1896_v20, %v4523_v12 }
 0x2f9   : > { %v2730_v39 = vpop.f32.mrf.mxu0  ;;  %v2174_v36 = vpop.f32.mrf.mxu2 }
 0x2fa   : > { %v2835_v9 = vadd.f32 %v2803_v10, %v5018_v22  ;;  %v2212_v17 = vadd.f32 %v2174_v36, %v1931_v60 }
 0x2fb   : > { %v2452_v21 = vpop.f32.mrf.mxu3 }
 0x2fc   : > { %2867 = vst.msk [vmem:[%s4560_s20 + $0xe0] sm:$0xff] %vm200_vm1, %v2835_v9  ;;  %v2490_v38 = vadd.f32 %v2452_v21, %v2212_v17 }
 0x2fe   : > { %v2768_v33 = vadd.f32 %v2730_v39, %v2490_v38 }
 0x2ff   : > { %v1899_v15 = vpop.f32.mrf.mxu1 }
 0x300   : > { %v2804_v32 = vadd.f32 %v4544_v37, %v2768_v33  ;;  %v1933_v42 = vadd.f32 %v1899_v15, %v4533_v49 }
 0x301   : > { %v2177_v13 = vpop.f32.mrf.mxu2  ;;  %v2733_v2 = vpop.f32.mrf.mxu0 }
 0x302   : > { %v2836_v46 = vadd.f32 %v2804_v32, %v5019_v57  ;;  %v2213_v31 = vadd.f32 %v2177_v13, %v1932_v14 }
 0x303   : > { %v2455_v11 = vpop.f32.mrf.mxu3 }
 0x304   : > { %2868 = vst.msk [vmem:[%s4560_s20 + $0xe8] sm:$0xff] %vm200_vm1, %v2836_v46  ;;  %v2491_v28 = vadd.f32 %v2455_v11, %v2213_v31 }
 0x306   : > { %v2769_v30 = vadd.f32 %v2733_v2, %v2491_v28 }
 0x308   : > { %v2805_v0 = vadd.f32 %v4544_v37, %v2769_v30 }
 0x309   : > { %v2180_v12 = vpop.f32.mrf.mxu2  ;;  %v2736_v23 = vpop.f32.mrf.mxu0 }
 0x30a   : > { %v2837_v59 = vadd.f32 %v2805_v0, %v5020_v44  ;;  %v2214_v52 = vadd.f32 %v2180_v12, %v1933_v42 }
 0x30b   : > { %v2458_v8 = vpop.f32.mrf.mxu3 }
 0x30c   : > { %2869 = vst.msk [vmem:[%s4560_s20 + $0xf0] sm:$0xff] %vm200_vm1, %v2837_v59  ;;  %v2492_v41 = vadd.f32 %v2458_v8, %v2214_v52 }
 0x30e   : > { %v2770_v7 = vadd.f32 %v2736_v23, %v2492_v41 }
 0x310   : > { %v2806_v54 = vadd.f32 %v4544_v37, %v2770_v7 }
 0x312   : > { %v2838_v6 = vadd.f32 %v2806_v54, %v4299_v19 }
 0x314   : > { %2870 = vst.msk [vmem:[%s4560_s20 + $0xf8] sm:$0xff] %vm200_vm1, %v2838_v6 }
 0x315 PF: > { %s13_s14 = sadd.s32 1, %s3499_s14   ;;  %s5021_s12 = smov %s3495_s13 }
 0x316   : > { %p10_p5 = scmp.ge.s32.totalorder %s13_s14, 4   ;;  %s5022_s13 = smov %s5024_s15 }
 0x318   :  { %12 = sbr.rel (!%p10_p5) target bundleno = 2 (0x2), region = 79 }

</bundles_post_ra>
